<compile_context>
chip_gen: v7x
topology: tpu7x:2x2x1
jax: 0.10.0
libtpu: 0.0.40
codegen_flags: <defaults>
</compile_context>

<pallas_src>
import functools

import jax
import jax.numpy as jnp
from jax.experimental import pallas as pl
from jax.experimental.pallas import tpu as pltpu


def _round_up(x, m):
    return ((x + m - 1) // m) * m


def _conv_bn_act_kernel(x_ref, w_ref, scale_ref, shift_ref, o_ref, *,
                        kh, kw, oh, ow, cin, oc_pad, stride):
    """One padded sample: out = relu(conv(x, W) * bn_scale + bn_shift).

    x_ref     : (H_pad, W_pad, CIN)     bf16 padded NHWC activation (one sample)
    w_ref     : (KH*KW, CIN, OC_PAD)    bf16 conv weight, tap-major
    scale_ref : (1, 1, OC_PAD)          f32 folded BN scale
    shift_ref : (1, 1, OC_PAD)          f32 folded BN shift
    o_ref     : (OH, OW, OC_PAD)        bf16 output (lane-dense, unmasked stores)
    """
    acc = jnp.zeros((oh, ow, oc_pad), jnp.float32)
    # In-kernel im2col: KH*KW shifted slices of the resident activation tile,
    # each contracted over CIN on the MXU (batched over the OH rows).
    for ki in range(kh):
        for kj in range(kw):
            if stride == 1:
                a = x_ref[ki:ki + oh, kj:kj + ow, :]            # (OH, OW, CIN)
            else:
                a = x_ref[pl.ds(ki, oh, stride), pl.ds(kj, ow, stride), :]
            w_tap = w_ref[ki * kw + kj]                          # (CIN, OC_PAD)
            w_b = jnp.broadcast_to(w_tap[None, :, :], (oh, cin, oc_pad))
            acc = acc + jnp.einsum("hwc,hco->hwo", a, w_b,
                                   preferred_element_type=jnp.float32)
    acc = acc * scale_ref[...] + shift_ref[...]                  # folded BatchNorm
    o_ref[...] = jnp.maximum(acc, 0.0).astype(o_ref.dtype)       # ReLU, bf16 store


@functools.partial(jax.jit, static_argnames=("stride", "padding", "eps"))
def conv2d_bn_relu_pallas(x_nchw, weight, gamma, beta, running_mean, running_var,
                          *, stride=1, padding=0, eps=1e-5):
    """Equivalent of relu(BN(F.conv2d(x, weight, bias=None, stride, padding)))
    with BatchNorm folded using running statistics (inference-mode forward)."""
    n, cin, h, w = x_nchw.shape
    oc, cin_w, kh, kw = weight.shape
    assert cin == cin_w

    oh = (h + 2 * padding - kh) // stride + 1
    ow = (w + 2 * padding - kw) // stride + 1
    oc_pad = max(_round_up(oc, 128), 128)   # dense 128-lane output; no K padding

    # ---- fold BN into per-output-channel scale/shift (f32) ----
    scale = (gamma / jnp.sqrt(running_var + eps)).astype(jnp.float32)
    shift = (beta - running_mean * scale).astype(jnp.float32)
    scale_row = jnp.pad(scale, (0, oc_pad - oc)).reshape(1, 1, oc_pad)
    shift_row = jnp.pad(shift, (0, oc_pad - oc)).reshape(1, 1, oc_pad)

    # ---- layout glue (only HBM-side prep; NO im2col materialization) ----
    x_nhwc = jnp.transpose(x_nchw, (0, 2, 3, 1)).astype(jnp.bfloat16)
    x_pad = jnp.pad(x_nhwc, ((0, 0), (padding, padding), (padding, padding), (0, 0)))
    h_pad, w_pad = h + 2 * padding, w + 2 * padding

    # weight (OC, CIN, KH, KW) -> (KH*KW, CIN, OC_PAD), tap-major, bf16.
    w_taps = jnp.transpose(weight, (2, 3, 1, 0)).reshape(kh * kw, cin, oc)
    w_taps = jnp.pad(w_taps, ((0, 0), (0, 0), (0, oc_pad - oc))).astype(jnp.bfloat16)

    kernel = functools.partial(_conv_bn_act_kernel, kh=kh, kw=kw, oh=oh, ow=ow,
                               cin=cin, oc_pad=oc_pad, stride=stride)

    flops = 2 * n * oh * ow * kh * kw * cin * oc_pad
    bytes_accessed = (x_pad.size * 2 + w_taps.size * 2
                      + (scale_row.size + shift_row.size) * 4
                      + n * oh * ow * oc_pad * 2)

    out = pl.pallas_call(
        kernel,
        out_shape=jax.ShapeDtypeStruct((n, oh, ow, oc_pad), jnp.bfloat16),
        grid_spec=pltpu.PrefetchScalarGridSpec(
            num_scalar_prefetch=0,
            grid=(n,),   # one padded sample per step; N=2 feeds both v7x TCs
            in_specs=[
                pl.BlockSpec((None, h_pad, w_pad, cin), lambda i: (i, 0, 0, 0)),
                pl.BlockSpec((kh * kw, cin, oc_pad), lambda i: (0, 0, 0)),
                pl.BlockSpec((1, 1, oc_pad), lambda i: (0, 0, 0)),
                pl.BlockSpec((1, 1, oc_pad), lambda i: (0, 0, 0)),
            ],
            out_specs=pl.BlockSpec((None, oh, ow, oc_pad), lambda i: (i, 0, 0, 0)),
        ),
        compiler_params=pltpu.CompilerParams(
            dimension_semantics=("parallel",),   # batch axis shards across TCs on v7x
        ),
        cost_estimate=pl.CostEstimate(flops=flops, transcendentals=0,
                                      bytes_accessed=bytes_accessed),
    )(x_pad, w_taps, scale_row, shift_row)

    # Slice real channels off the 128-lane pad, restore PyTorch NCHW / f32.
    out = out[..., :oc].astype(jnp.float32)
    return jnp.transpose(out, (0, 3, 1, 2))


def _reference_conv_bn_relu(x_nchw, weight, gamma, beta, mean, var,
                            *, stride, padding, eps=1e-5):
    out = jax.lax.conv_general_dilated(
        x_nchw.astype(jnp.float32),
        weight.astype(jnp.float32),
        window_strides=(stride, stride),
        padding=[(padding, padding), (padding, padding)],
        dimension_numbers=("NCHW", "OIHW", "NCHW"),
    )
    scale = gamma / jnp.sqrt(var + eps)
    shift = beta - mean * scale
    out = out * scale.reshape(1, -1, 1, 1) + shift.reshape(1, -1, 1, 1)
    return jnp.maximum(out, 0.0)


if __name__ == "__main__":
    # Module config: Conv2D_BN(in_channels=4, out_channels=8, kernel_size=3,
    #                          stride=1, padding=1, activation=relu)
    N, C_IN, H, W = 2, 4, 16, 16
    C_OUT, K = 8, 3
    STRIDE, PADDING = 1, 1

    key = jax.random.PRNGKey(0)
    kx, kw_, kg, kb, km, kv = jax.random.split(key, 6)

    x = jax.random.normal(kx, (N, C_IN, H, W), dtype=jnp.float32)

    # Deterministic parameter init (conv: PyTorch-like fan-in bound; BN: non-trivial).
    fan_in = C_IN * K * K
    bound = 1.0 / (fan_in ** 0.5)
    weight = jax.random.uniform(
        kw_, (C_OUT, C_IN, K, K), dtype=jnp.float32, minval=-bound, maxval=bound
    )
    gamma = jax.random.uniform(kg, (C_OUT,), dtype=jnp.float32, minval=0.5, maxval=1.5)
    beta = 0.1 * jax.random.normal(kb, (C_OUT,), dtype=jnp.float32)
    running_mean = 0.1 * jax.random.normal(km, (C_OUT,), dtype=jnp.float32)
    running_var = jax.random.uniform(kv, (C_OUT,), dtype=jnp.float32, minval=0.5, maxval=1.5)

    out = conv2d_bn_relu_pallas(
        x, weight, gamma, beta, running_mean, running_var,
        stride=STRIDE, padding=PADDING,
    )
    out = jax.block_until_ready(out)

    ref = _reference_conv_bn_relu(
        x, weight, gamma, beta, running_mean, running_var,
        stride=STRIDE, padding=PADDING,
    )
    assert out.shape == (N, C_OUT, H, W), out.shape
    # bf16 activations/weights/output with f32 accumulation -> loosened tolerance.
    assert jnp.allclose(out, ref, atol=5e-2, rtol=5e-2), "mismatch vs reference"

    print("KERNEL_OK")
</pallas_src>

<mosaic_0001>
module attributes {stable_mosaic.version = 11 : i64} {
  func.func @_conv_bn_act_kernel(%arg0: i32, %arg1: memref<1x18x18x4xbf16, #tpu.memory_space<vmem>>, %arg2: memref<9x4x128xbf16, #tpu.memory_space<vmem>>, %arg3: memref<1x1x128xf32, #tpu.memory_space<vmem>>, %arg4: memref<1x1x128xf32, #tpu.memory_space<vmem>>, %arg5: memref<1x16x16x128xbf16, #tpu.memory_space<vmem>>) attributes {dimension_semantics = [#tpu.dimension_semantics<parallel>], iteration_bounds = array<i64: 2>, scalar_prefetch = 0 : i64, scratch_operands = 0 : i64, tpu.core_type = #tpu.core_type<tc>, window_params = [{transform_indices = @transform_0, window_bounds = array<i64: 1, 18, 18, 4>}, {pipeline_mode = #tpu.pipeline_mode<synchronous>, transform_indices = @transform_1, window_bounds = array<i64: 9, 4, 128>}, {pipeline_mode = #tpu.pipeline_mode<synchronous>, transform_indices = @transform_2, window_bounds = array<i64: 1, 1, 128>}, {pipeline_mode = #tpu.pipeline_mode<synchronous>, transform_indices = @transform_3, window_bounds = array<i64: 1, 1, 128>}, {transform_indices = @transform_4, window_bounds = array<i64: 1, 16, 16, 128>}]} {
    %cst = arith.constant 0.000000e+00 : f32
    %0 = vector.broadcast %cst : f32 to vector<16x16x128xf32>
    %c0 = arith.constant 0 : index
    %c0_0 = arith.constant 0 : index
    %c0_1 = arith.constant 0 : index
    %c0_2 = arith.constant 0 : index
    %1 = vector.load %arg1[%c0, %c0_0, %c0_1, %c0_2] : memref<1x18x18x4xbf16, #tpu.memory_space<vmem>>, vector<1x16x16x4xbf16>
    %2 = vector.shape_cast %1 : vector<1x16x16x4xbf16> to vector<16x16x4xbf16>
    %c0_3 = arith.constant 0 : index
    %c0_4 = arith.constant 0 : index
    %c0_5 = arith.constant 0 : index
    %3 = vector.load %arg2[%c0_3, %c0_4, %c0_5] : memref<9x4x128xbf16, #tpu.memory_space<vmem>>, vector<1x4x128xbf16>
    %4 = vector.shape_cast %3 : vector<1x4x128xbf16> to vector<4x128xbf16>
    %5 = vector.shape_cast %4 : vector<4x128xbf16> to vector<1x4x128xbf16>
    %6 = vector.shape_cast %5 : vector<1x4x128xbf16> to vector<1x4x128xbf16>
    %7 = vector.broadcast %6 : vector<1x4x128xbf16> to vector<16x4x128xbf16>
    "tpu.trace_start"() <{level = 10 : i32, message = "hwc,hco->hwo"}> : () -> ()
    %cst_6 = arith.constant dense<0.000000e+00> : vector<16x16x128xf32>
    %8 = tpu.matmul %2, %7, %cst_6 {dimension_numbers = #tpu.dot_dimension_numbers<[2], [1], [1], [2], [0, 0, 0, 1, 1, 2], [0], [0]>} : vector<16x16x4xbf16>, vector<16x4x128xbf16>, vector<16x16x128xf32> -> vector<16x16x128xf32>
    "tpu.trace_stop"() : () -> ()
    %9 = arith.addf %0, %8 : vector<16x16x128xf32>
    %c0_7 = arith.constant 0 : index
    %c0_8 = arith.constant 0 : index
    %c1 = arith.constant 1 : index
    %c0_9 = arith.constant 0 : index
    %10 = vector.load %arg1[%c0_7, %c0_8, %c1, %c0_9] : memref<1x18x18x4xbf16, #tpu.memory_space<vmem>>, vector<1x16x16x4xbf16>
    %11 = vector.shape_cast %10 : vector<1x16x16x4xbf16> to vector<16x16x4xbf16>
    %c1_10 = arith.constant 1 : index
    %c0_11 = arith.constant 0 : index
    %c0_12 = arith.constant 0 : index
    %12 = vector.load %arg2[%c1_10, %c0_11, %c0_12] : memref<9x4x128xbf16, #tpu.memory_space<vmem>>, vector<1x4x128xbf16>
    %13 = vector.shape_cast %12 : vector<1x4x128xbf16> to vector<4x128xbf16>
    %14 = vector.shape_cast %13 : vector<4x128xbf16> to vector<1x4x128xbf16>
    %15 = vector.shape_cast %14 : vector<1x4x128xbf16> to vector<1x4x128xbf16>
    %16 = vector.broadcast %15 : vector<1x4x128xbf16> to vector<16x4x128xbf16>
    "tpu.trace_start"() <{level = 10 : i32, message = "hwc,hco->hwo"}> : () -> ()
    %cst_13 = arith.constant dense<0.000000e+00> : vector<16x16x128xf32>
    %17 = tpu.matmul %11, %16, %cst_13 {dimension_numbers = #tpu.dot_dimension_numbers<[2], [1], [1], [2], [0, 0, 0, 1, 1, 2], [0], [0]>} : vector<16x16x4xbf16>, vector<16x4x128xbf16>, vector<16x16x128xf32> -> vector<16x16x128xf32>
    "tpu.trace_stop"() : () -> ()
    %18 = arith.addf %9, %17 : vector<16x16x128xf32>
    %c0_14 = arith.constant 0 : index
    %c0_15 = arith.constant 0 : index
    %c2 = arith.constant 2 : index
    %c0_16 = arith.constant 0 : index
    %19 = vector.load %arg1[%c0_14, %c0_15, %c2, %c0_16] : memref<1x18x18x4xbf16, #tpu.memory_space<vmem>>, vector<1x16x16x4xbf16>
    %20 = vector.shape_cast %19 : vector<1x16x16x4xbf16> to vector<16x16x4xbf16>
    %c2_17 = arith.constant 2 : index
    %c0_18 = arith.constant 0 : index
    %c0_19 = arith.constant 0 : index
    %21 = vector.load %arg2[%c2_17, %c0_18, %c0_19] : memref<9x4x128xbf16, #tpu.memory_space<vmem>>, vector<1x4x128xbf16>
    %22 = vector.shape_cast %21 : vector<1x4x128xbf16> to vector<4x128xbf16>
    %23 = vector.shape_cast %22 : vector<4x128xbf16> to vector<1x4x128xbf16>
    %24 = vector.shape_cast %23 : vector<1x4x128xbf16> to vector<1x4x128xbf16>
    %25 = vector.broadcast %24 : vector<1x4x128xbf16> to vector<16x4x128xbf16>
    "tpu.trace_start"() <{level = 10 : i32, message = "hwc,hco->hwo"}> : () -> ()
    %cst_20 = arith.constant dense<0.000000e+00> : vector<16x16x128xf32>
    %26 = tpu.matmul %20, %25, %cst_20 {dimension_numbers = #tpu.dot_dimension_numbers<[2], [1], [1], [2], [0, 0, 0, 1, 1, 2], [0], [0]>} : vector<16x16x4xbf16>, vector<16x4x128xbf16>, vector<16x16x128xf32> -> vector<16x16x128xf32>
    "tpu.trace_stop"() : () -> ()
    %27 = arith.addf %18, %26 : vector<16x16x128xf32>
    %c0_21 = arith.constant 0 : index
    %c1_22 = arith.constant 1 : index
    %c0_23 = arith.constant 0 : index
    %c0_24 = arith.constant 0 : index
    %28 = vector.load %arg1[%c0_21, %c1_22, %c0_23, %c0_24] : memref<1x18x18x4xbf16, #tpu.memory_space<vmem>>, vector<1x16x16x4xbf16>
    %29 = vector.shape_cast %28 : vector<1x16x16x4xbf16> to vector<16x16x4xbf16>
    %c3 = arith.constant 3 : index
    %c0_25 = arith.constant 0 : index
    %c0_26 = arith.constant 0 : index
    %30 = vector.load %arg2[%c3, %c0_25, %c0_26] : memref<9x4x128xbf16, #tpu.memory_space<vmem>>, vector<1x4x128xbf16>
    %31 = vector.shape_cast %30 : vector<1x4x128xbf16> to vector<4x128xbf16>
    %32 = vector.shape_cast %31 : vector<4x128xbf16> to vector<1x4x128xbf16>
    %33 = vector.shape_cast %32 : vector<1x4x128xbf16> to vector<1x4x128xbf16>
    %34 = vector.broadcast %33 : vector<1x4x128xbf16> to vector<16x4x128xbf16>
    "tpu.trace_start"() <{level = 10 : i32, message = "hwc,hco->hwo"}> : () -> ()
    %cst_27 = arith.constant dense<0.000000e+00> : vector<16x16x128xf32>
    %35 = tpu.matmul %29, %34, %cst_27 {dimension_numbers = #tpu.dot_dimension_numbers<[2], [1], [1], [2], [0, 0, 0, 1, 1, 2], [0], [0]>} : vector<16x16x4xbf16>, vector<16x4x128xbf16>, vector<16x16x128xf32> -> vector<16x16x128xf32>
    "tpu.trace_stop"() : () -> ()
    %36 = arith.addf %27, %35 : vector<16x16x128xf32>
    %c0_28 = arith.constant 0 : index
    %c1_29 = arith.constant 1 : index
    %c1_30 = arith.constant 1 : index
    %c0_31 = arith.constant 0 : index
    %37 = vector.load %arg1[%c0_28, %c1_29, %c1_30, %c0_31] : memref<1x18x18x4xbf16, #tpu.memory_space<vmem>>, vector<1x16x16x4xbf16>
    %38 = vector.shape_cast %37 : vector<1x16x16x4xbf16> to vector<16x16x4xbf16>
    %c4 = arith.constant 4 : index
    %c0_32 = arith.constant 0 : index
    %c0_33 = arith.constant 0 : index
    %39 = vector.load %arg2[%c4, %c0_32, %c0_33] : memref<9x4x128xbf16, #tpu.memory_space<vmem>>, vector<1x4x128xbf16>
    %40 = vector.shape_cast %39 : vector<1x4x128xbf16> to vector<4x128xbf16>
    %41 = vector.shape_cast %40 : vector<4x128xbf16> to vector<1x4x128xbf16>
    %42 = vector.shape_cast %41 : vector<1x4x128xbf16> to vector<1x4x128xbf16>
    %43 = vector.broadcast %42 : vector<1x4x128xbf16> to vector<16x4x128xbf16>
    "tpu.trace_start"() <{level = 10 : i32, message = "hwc,hco->hwo"}> : () -> ()
    %cst_34 = arith.constant dense<0.000000e+00> : vector<16x16x128xf32>
    %44 = tpu.matmul %38, %43, %cst_34 {dimension_numbers = #tpu.dot_dimension_numbers<[2], [1], [1], [2], [0, 0, 0, 1, 1, 2], [0], [0]>} : vector<16x16x4xbf16>, vector<16x4x128xbf16>, vector<16x16x128xf32> -> vector<16x16x128xf32>
    "tpu.trace_stop"() : () -> ()
    %45 = arith.addf %36, %44 : vector<16x16x128xf32>
    %c0_35 = arith.constant 0 : index
    %c1_36 = arith.constant 1 : index
    %c2_37 = arith.constant 2 : index
    %c0_38 = arith.constant 0 : index
    %46 = vector.load %arg1[%c0_35, %c1_36, %c2_37, %c0_38] : memref<1x18x18x4xbf16, #tpu.memory_space<vmem>>, vector<1x16x16x4xbf16>
    %47 = vector.shape_cast %46 : vector<1x16x16x4xbf16> to vector<16x16x4xbf16>
    %c5 = arith.constant 5 : index
    %c0_39 = arith.constant 0 : index
    %c0_40 = arith.constant 0 : index
    %48 = vector.load %arg2[%c5, %c0_39, %c0_40] : memref<9x4x128xbf16, #tpu.memory_space<vmem>>, vector<1x4x128xbf16>
    %49 = vector.shape_cast %48 : vector<1x4x128xbf16> to vector<4x128xbf16>
    %50 = vector.shape_cast %49 : vector<4x128xbf16> to vector<1x4x128xbf16>
    %51 = vector.shape_cast %50 : vector<1x4x128xbf16> to vector<1x4x128xbf16>
    %52 = vector.broadcast %51 : vector<1x4x128xbf16> to vector<16x4x128xbf16>
    "tpu.trace_start"() <{level = 10 : i32, message = "hwc,hco->hwo"}> : () -> ()
    %cst_41 = arith.constant dense<0.000000e+00> : vector<16x16x128xf32>
    %53 = tpu.matmul %47, %52, %cst_41 {dimension_numbers = #tpu.dot_dimension_numbers<[2], [1], [1], [2], [0, 0, 0, 1, 1, 2], [0], [0]>} : vector<16x16x4xbf16>, vector<16x4x128xbf16>, vector<16x16x128xf32> -> vector<16x16x128xf32>
    "tpu.trace_stop"() : () -> ()
    %54 = arith.addf %45, %53 : vector<16x16x128xf32>
    %c0_42 = arith.constant 0 : index
    %c2_43 = arith.constant 2 : index
    %c0_44 = arith.constant 0 : index
    %c0_45 = arith.constant 0 : index
    %55 = vector.load %arg1[%c0_42, %c2_43, %c0_44, %c0_45] : memref<1x18x18x4xbf16, #tpu.memory_space<vmem>>, vector<1x16x16x4xbf16>
    %56 = vector.shape_cast %55 : vector<1x16x16x4xbf16> to vector<16x16x4xbf16>
    %c6 = arith.constant 6 : index
    %c0_46 = arith.constant 0 : index
    %c0_47 = arith.constant 0 : index
    %57 = vector.load %arg2[%c6, %c0_46, %c0_47] : memref<9x4x128xbf16, #tpu.memory_space<vmem>>, vector<1x4x128xbf16>
    %58 = vector.shape_cast %57 : vector<1x4x128xbf16> to vector<4x128xbf16>
    %59 = vector.shape_cast %58 : vector<4x128xbf16> to vector<1x4x128xbf16>
    %60 = vector.shape_cast %59 : vector<1x4x128xbf16> to vector<1x4x128xbf16>
    %61 = vector.broadcast %60 : vector<1x4x128xbf16> to vector<16x4x128xbf16>
    "tpu.trace_start"() <{level = 10 : i32, message = "hwc,hco->hwo"}> : () -> ()
    %cst_48 = arith.constant dense<0.000000e+00> : vector<16x16x128xf32>
    %62 = tpu.matmul %56, %61, %cst_48 {dimension_numbers = #tpu.dot_dimension_numbers<[2], [1], [1], [2], [0, 0, 0, 1, 1, 2], [0], [0]>} : vector<16x16x4xbf16>, vector<16x4x128xbf16>, vector<16x16x128xf32> -> vector<16x16x128xf32>
    "tpu.trace_stop"() : () -> ()
    %63 = arith.addf %54, %62 : vector<16x16x128xf32>
    %c0_49 = arith.constant 0 : index
    %c2_50 = arith.constant 2 : index
    %c1_51 = arith.constant 1 : index
    %c0_52 = arith.constant 0 : index
    %64 = vector.load %arg1[%c0_49, %c2_50, %c1_51, %c0_52] : memref<1x18x18x4xbf16, #tpu.memory_space<vmem>>, vector<1x16x16x4xbf16>
    %65 = vector.shape_cast %64 : vector<1x16x16x4xbf16> to vector<16x16x4xbf16>
    %c7 = arith.constant 7 : index
    %c0_53 = arith.constant 0 : index
    %c0_54 = arith.constant 0 : index
    %66 = vector.load %arg2[%c7, %c0_53, %c0_54] : memref<9x4x128xbf16, #tpu.memory_space<vmem>>, vector<1x4x128xbf16>
    %67 = vector.shape_cast %66 : vector<1x4x128xbf16> to vector<4x128xbf16>
    %68 = vector.shape_cast %67 : vector<4x128xbf16> to vector<1x4x128xbf16>
    %69 = vector.shape_cast %68 : vector<1x4x128xbf16> to vector<1x4x128xbf16>
    %70 = vector.broadcast %69 : vector<1x4x128xbf16> to vector<16x4x128xbf16>
    "tpu.trace_start"() <{level = 10 : i32, message = "hwc,hco->hwo"}> : () -> ()
    %cst_55 = arith.constant dense<0.000000e+00> : vector<16x16x128xf32>
    %71 = tpu.matmul %65, %70, %cst_55 {dimension_numbers = #tpu.dot_dimension_numbers<[2], [1], [1], [2], [0, 0, 0, 1, 1, 2], [0], [0]>} : vector<16x16x4xbf16>, vector<16x4x128xbf16>, vector<16x16x128xf32> -> vector<16x16x128xf32>
    "tpu.trace_stop"() : () -> ()
    %72 = arith.addf %63, %71 : vector<16x16x128xf32>
    %c0_56 = arith.constant 0 : index
    %c2_57 = arith.constant 2 : index
    %c2_58 = arith.constant 2 : index
    %c0_59 = arith.constant 0 : index
    %73 = vector.load %arg1[%c0_56, %c2_57, %c2_58, %c0_59] : memref<1x18x18x4xbf16, #tpu.memory_space<vmem>>, vector<1x16x16x4xbf16>
    %74 = vector.shape_cast %73 : vector<1x16x16x4xbf16> to vector<16x16x4xbf16>
    %c8 = arith.constant 8 : index
    %c0_60 = arith.constant 0 : index
    %c0_61 = arith.constant 0 : index
    %75 = vector.load %arg2[%c8, %c0_60, %c0_61] : memref<9x4x128xbf16, #tpu.memory_space<vmem>>, vector<1x4x128xbf16>
    %76 = vector.shape_cast %75 : vector<1x4x128xbf16> to vector<4x128xbf16>
    %77 = vector.shape_cast %76 : vector<4x128xbf16> to vector<1x4x128xbf16>
    %78 = vector.shape_cast %77 : vector<1x4x128xbf16> to vector<1x4x128xbf16>
    %79 = vector.broadcast %78 : vector<1x4x128xbf16> to vector<16x4x128xbf16>
    "tpu.trace_start"() <{level = 10 : i32, message = "hwc,hco->hwo"}> : () -> ()
    %cst_62 = arith.constant dense<0.000000e+00> : vector<16x16x128xf32>
    %80 = tpu.matmul %74, %79, %cst_62 {dimension_numbers = #tpu.dot_dimension_numbers<[2], [1], [1], [2], [0, 0, 0, 1, 1, 2], [0], [0]>} : vector<16x16x4xbf16>, vector<16x4x128xbf16>, vector<16x16x128xf32> -> vector<16x16x128xf32>
    "tpu.trace_stop"() : () -> ()
    %81 = arith.addf %72, %80 : vector<16x16x128xf32>
    %c0_63 = arith.constant 0 : index
    %c0_64 = arith.constant 0 : index
    %c0_65 = arith.constant 0 : index
    %82 = vector.load %arg3[%c0_63, %c0_64, %c0_65] : memref<1x1x128xf32, #tpu.memory_space<vmem>>, vector<1x1x128xf32>
    %83 = vector.broadcast %82 : vector<1x1x128xf32> to vector<16x16x128xf32>
    %84 = arith.mulf %81, %83 : vector<16x16x128xf32>
    %c0_66 = arith.constant 0 : index
    %c0_67 = arith.constant 0 : index
    %c0_68 = arith.constant 0 : index
    %85 = vector.load %arg4[%c0_66, %c0_67, %c0_68] : memref<1x1x128xf32, #tpu.memory_space<vmem>>, vector<1x1x128xf32>
    %86 = vector.broadcast %85 : vector<1x1x128xf32> to vector<16x16x128xf32>
    %87 = arith.addf %84, %86 : vector<16x16x128xf32>
    %cst_69 = arith.constant 0.000000e+00 : f32
    %88 = vector.broadcast %cst_69 : f32 to vector<16x16x128xf32>
    %89 = arith.maximumf %87, %88 : vector<16x16x128xf32>
    %90 = arith.truncf %89 : vector<16x16x128xf32> to vector<16x16x128xbf16>
    %c0_70 = arith.constant 0 : index
    %c0_71 = arith.constant 0 : index
    %c0_72 = arith.constant 0 : index
    %c0_73 = arith.constant 0 : index
    %91 = vector.load %arg5[%c0_70, %c0_71, %c0_72, %c0_73] : memref<1x16x16x128xbf16, #tpu.memory_space<vmem>>, vector<1x16x16x128xbf16>
    %92 = vector.shape_cast %91 : vector<1x16x16x128xbf16> to vector<16x16x128xbf16>
    %93 = vector.shape_cast %90 : vector<16x16x128xbf16> to vector<1x16x16x128xbf16>
    tpu.vector_store %arg5[%c0_70, %c0_71, %c0_72, %c0_73], %93 {strides = array<i32>} : memref<1x16x16x128xbf16, #tpu.memory_space<vmem>>, vector<1x16x16x128xbf16>,
    return
  }
  func.func @transform_0(%arg0: i32) -> (i32, i32, i32, i32) {
    %c0_i32 = arith.constant 0 : i32
    %c0_i32_0 = arith.constant 0 : i32
    %c0_i32_1 = arith.constant 0 : i32
    %c0_i32_2 = arith.constant 0 : i32
    return %arg0, %c0_i32, %c0_i32_0, %c0_i32_1 : i32, i32, i32, i32
  }
  func.func @transform_1(%arg0: i32) -> (i32, i32, i32) {
    %c0_i32 = arith.constant 0 : i32
    %c0_i32_0 = arith.constant 0 : i32
    %c0_i32_1 = arith.constant 0 : i32
    %c0_i32_2 = arith.constant 0 : i32
    return %c0_i32, %c0_i32_0, %c0_i32_1 : i32, i32, i32
  }
  func.func @transform_2(%arg0: i32) -> (i32, i32, i32) {
    %c0_i32 = arith.constant 0 : i32
    %c0_i32_0 = arith.constant 0 : i32
    %c0_i32_1 = arith.constant 0 : i32
    %c0_i32_2 = arith.constant 0 : i32
    return %c0_i32, %c0_i32_0, %c0_i32_1 : i32, i32, i32
  }
  func.func @transform_3(%arg0: i32) -> (i32, i32, i32) {
    %c0_i32 = arith.constant 0 : i32
    %c0_i32_0 = arith.constant 0 : i32
    %c0_i32_1 = arith.constant 0 : i32
    %c0_i32_2 = arith.constant 0 : i32
    return %c0_i32, %c0_i32_0, %c0_i32_1 : i32, i32, i32
  }
  func.func @transform_4(%arg0: i32) -> (i32, i32, i32, i32) {
    %c0_i32 = arith.constant 0 : i32
    %c0_i32_0 = arith.constant 0 : i32
    %c0_i32_1 = arith.constant 0 : i32
    %c0_i32_2 = arith.constant 0 : i32
    return %arg0, %c0_i32, %c0_i32_0, %c0_i32_1 : i32, i32, i32, i32
  }
}

</mosaic_0001>

<bundles_post_ra>
// kernel: conv2d_bn_relu_pallas.1
= control target key start
LH: loop header
LB: loop body
LE: loop exit
PB: predicated region body
PF: predicated region fallthrough
CT: control target
= control target key end

     0   :  { %s12016_s15 = smov 0   ;;  %s13241_s0 = inlined_call_operand.vmem [shape: bf16[2,18,18,4], index: 0, kind: input, shape index: {}]   ;;  %s13242_s1 = inlined_call_operand.vmem [shape: bf16[9,4,128], index: 1, kind: input, shape index: {}]   ;;  %s13243_s2 = inlined_call_operand.vmem [shape: f32[1,1,128], index: 2, kind: input, shape index: {}]   ;;  %s13244_s3 = inlined_call_operand.vmem [shape: f32[1,1,128], index: 3, kind: input, shape index: {}]   ;;  %s13245_s4 = inlined_call_operand.vmem [shape: bf16[2,16,16,128], index: 4, kind: output, shape index: {}]  }
   0x1 LB: > { %s9246_s16 = sadd.s32 4294967295, %s11987_s15   ;;  %p9250_p0 = scmp.ge.s32.totalorder %s11987_s15, 1  ;;  %s11987_s15 = sphi %s12016_s15, %s14_s15  }
   0x2   : > { %p162_p1 = scmp.lt.s32.totalorder %s11987_s15, 3 }
   0x4   : > { %p163_p2 = pnand %p9250_p0, %p162_p1 }
   0x5   : > { %v9254_v0 = vld [vmem:[%s13242_s1 + $0x2] sm:$0x3] (!%p163_p2)  ;;  %vm307_vm0 = vcmask (!%p163_p2), 1041408   ;;  %p188_p3 = scmp.lt.s32.totalorder (!%p163_p2), %s9246_s16, 1  ;;  %v11989_v1 = vmov (!%p163_p2), 0.0   ;;  %vm11990_vm1 = vmmov (!%p163_p2), 0  }
   0x6   : > { %166 = sbr.rel (%p163_p2) target bundleno = 817 (0x331), region = 36  ;;  %10354 = vmatprep.subr.bf16.mxu0 (!%p163_p2), %v11989_v1  ;;  %10360 = vmatprep.subr.bf16.mxu1 (!%p163_p2), %v11989_v1  ;;  %v12030_v2 = vsel (!%p163_p2), %vm307_vm0, %v9254_v0, 0  ;;  %vm290_vm2 = vsmask.f32 (!%p163_p2), 7424  ;;  %vm303_vm3 = vcmask (!%p163_p2), 31744   ;;  %vm2157_vm4 = vcmask (!%p163_p2), 1046528  }
   0x7   : > { %10355 = vmatpush3.bf16.msra.mxu0 (!%p163_p2), %v12030_v2  ;;  %10361 = vmatpush3.bf16.msra.mxu1 (!%p163_p2), %v12030_v2 }
   0x8   : > { %10356 = vmatprep.mubr.msk.bf16.mxu0 (!%p163_p2), %vm11990_vm1, %v11989_v1  ;;  %10362 = vmatprep.mubr.msk.bf16.mxu1 (!%p163_p2), %vm11990_vm1, %v11989_v1 }
   0x9   : > { %10366 = vmatprep.subr.bf16.mxu0 (!%p163_p2), %v11989_v1  ;;  %10372 = vmatprep.subr.bf16.mxu1 (!%p163_p2), %v11989_v1 }
   0xd   : > { %s13247_s16 = smov (!%p188_p3, %s9246_s16), 1 }
   0xe   : > { %s11730_s19 = smul.u32 216, %s13247_s16 }
  0x10   : > { %s12046_s22 = scalar_lea.vmem %s13241_s0, %s11730_s19  ;;  %s9938_s19 = sshll.u32 %s13247_s16, 7 }
  0x11   : > { %v11741_v3 = vld [vmem:[%s12046_s22] sm:$0xff]   ;;  %v11742_v4 = vld [vmem:[%s12046_s22 + $0x8] ss:$0 sps:$4 sm:$0x11]   ;;  %v11743_v5 = vld [vmem:[%s12046_s22 + $0xc] sm:$0xff]  }
  0x12   : > { %v292_v6 = vshrl.u32 %v11741_v3, 16  ;;  %v294_v7 = vshll.u32 %v11741_v3, 16  ;;  %v299_v8 = vshll.u32 %v11742_v4, 16  ;;  %v11744_v9 = vld [vmem:[%s12046_s22 + $0x14] ss:$0 sps:$4 sm:$0x11]  }
  0x13   : > { %v361_v10 = vshrl.u32 %v11743_v5, 16  ;;  %v363_v11 = vshll.u32 %v11743_v5, 16  ;;  %v368_v14 = vshll.u32 %v11744_v9, 16  ;;  %v11745_v15 = vld [vmem:[%s12046_s22 + $0x18] sm:$0xff]   ;;  %v11747_v22 = vld [vmem:[%s12046_s22 + $0x24] sm:$0xff]   ;;  %v11749_v30 = vld [vmem:[%s12046_s22 + $0x30] sm:$0xff]  }
  0x14   : > { %v296_v12 = vrot.slane %v294_v7, 1  ;;  %v301_v13 = vrot.slane %v299_v8, 1  ;;  %v11746_v17 = vld [vmem:[%s12046_s22 + $0x20] ss:$0 sps:$4 sm:$0x11]   ;;  %v425_v20 = vshrl.u32 %v11745_v15, 16 }
  0x15   : > { %v365_v16 = vrot.slane %v363_v11, 1  ;;  %v370_v19 = vrot.slane %v368_v14, 1  ;;  %v427_v21 = vshll.u32 %v11745_v15, 16  ;;  %v432_v24 = vshll.u32 %v11746_v17, 16  ;;  %v11751_v39 = vld [vmem:[%s12046_s22 + $0x3c] sm:$0xff]   ;;  %v11753_v46 = vld [vmem:[%s12046_s22 + $0x48] sm:$0xff]  }
  0x16   : > { %v297_v18 = vor.u32 %v296_v12, %v292_v6  ;;  %v11748_v25 = vld [vmem:[%s12046_s22 + $0x2c] ss:$0 sps:$4 sm:$0x11]   ;;  %v489_v28 = vshrl.u32 %v11747_v22, 16  ;;  %v491_v29 = vshll.u32 %v11747_v22, 16  ;;  %v555_v37 = vshll.u32 %v11749_v30, 16 }
  0x17   : > { %v366_v23 = vor.u32 %v365_v16, %v361_v10  ;;  %v429_v27 = vrot.slane %v427_v21, 1  ;;  %v496_v32 = vshll.u32 %v11748_v25, 16  ;;  %v434_v34 = vrot.slane %v432_v24, 1  ;;  %v11750_v36 = vld [vmem:[%s12046_s22 + $0x38] ss:$0 sps:$4 sm:$0x11]  }
  0x18   : > { %v302_v26 = vsel %vm290_vm2, %v297_v18, %v301_v13  ;;  %v493_v35 = vrot.slane %v491_v29, 1  ;;  %v553_v41 = vshrl.u32 %v11749_v30, 16  ;;  %v560_v42 = vshll.u32 %v11750_v36, 16  ;;  %v11752_v44 = vld [vmem:[%s12046_s22 + $0x44] ss:$0 sps:$4 sm:$0x11]  }
  0x19   : > { %10357 = vmatmul.mubr.msk.bf16.vlgmr.msra.gmra.mrb[0].mxu0 %vm303_vm3, %v302_v26  ;;  %v371_v31 = vsel %vm290_vm2, %v366_v23, %v370_v19  ;;  %v430_v33 = vor.u32 %v429_v27, %v425_v20  ;;  %v498_v38 = vrot.slane %v496_v32, 1  ;;  %v557_v43 = vrot.slane %v555_v37, 1  ;;  %v11755_v48 = vld [vmem:[%s12046_s22 + $0x54] sm:$0xff]   ;;  %v11754_v55 = vld [vmem:[%s12046_s22 + $0x50] ss:$0 sps:$4 sm:$0x11]  }
  0x1a   : > { %10363 = vmatmul.mubr.msk.bf16.vlgmr.msra.gmra.mrb[0].mxu1 %vm303_vm3, %v371_v31  ;;  %10367 = vmatpush3.bf16.msra.mxu0 %v12030_v2  ;;  %v494_v40 = vor.u32 %v493_v35, %v489_v28  ;;  %v619_v45 = vshll.u32 %v11751_v39, 16  ;;  %v617_v50 = vshrl.u32 %v11751_v39, 16  ;;  %v624_v52 = vshll.u32 %v11752_v44, 16  ;;  %v11756_v57 = vld [vmem:[%s12046_s22 + $0x5c] ss:$0 sps:$4 sm:$0x11]  }
  0x1b   : > { %10373 = vmatpush3.bf16.msra.mxu1 %v12030_v2  ;;  %10368 = vmatprep.mubr.msk.bf16.mxu0 %vm11990_vm1, %v11989_v1  ;;  %v435_v47 = vsel %vm290_vm2, %v430_v33, %v434_v34  ;;  %v562_v53 = vrot.slane %v560_v42, 1  ;;  %v558_v54 = vor.u32 %v557_v43, %v553_v41  ;;  %v683_v56 = vshll.u32 %v11753_v46, 16  ;;  %v11757_v63 = vld [vmem:[%s12046_s22 + $0x60] sm:$0xff]   ;;  %v11758_v8 = vld [vmem:[%s12046_s22 + $0x68] ss:$0 sps:$4 sm:$0x11]  }
  0x1c   : > { %10374 = vmatprep.mubr.msk.bf16.mxu1 %vm11990_vm1, %v11989_v1  ;;  %10378 = vmatprep.subr.bf16.mxu0 %v11989_v1  ;;  %v499_v49 = vsel %vm290_vm2, %v494_v40, %v498_v38  ;;  %v621_v51 = vrot.slane %v619_v45, 1  ;;  %v747_v58 = vshll.u32 %v11755_v48, 16  ;;  %v626_v60 = vrot.slane %v624_v52, 1  ;;  %v11759_v9 = vld [vmem:[%s12046_s22 + $0x6c] sm:$0xff]   ;;  %v11761_v23 = vld [vmem:[%s12046_s22 + $0x78] sm:$0xff]   ;;  %v11763_v26 = vld [vmem:[%s12046_s22 + $0x84] sm:$0xff]  }
  0x1d   : > { %10384 = vmatprep.subr.bf16.mxu1 %v11989_v1  ;;  %v681_v61 = vshrl.u32 %v11753_v46, 16  ;;  %v745_v62 = vshrl.u32 %v11755_v48, 16  ;;  %v563_v0 = vsel %vm290_vm2, %v558_v54, %v562_v53  ;;  %v685_v3 = vrot.slane %v683_v56, 1  ;;  %v11760_v11 = vld [vmem:[%s12046_s22 + $0x74] ss:$0 sps:$4 sm:$0x11]  }
  0x1e   : > { %v622_v59 = vor.u32 %v621_v51, %v617_v50  ;;  %v688_v4 = vshll.u32 %v11754_v55, 16  ;;  %v749_v5 = vrot.slane %v747_v58, 1  ;;  %v752_v6 = vshll.u32 %v11756_v57, 16  ;;  %v11762_v29 = vld [vmem:[%s12046_s22 + $0x80] ss:$0 sps:$4 sm:$0x11]  }
  0x1f   : > { %v811_v10 = vshll.u32 %v11757_v63, 16  ;;  %v686_v12 = vor.u32 %v685_v3, %v681_v61  ;;  %v875_v16 = vshll.u32 %v11759_v9, 16  ;;  %v816_v17 = vshll.u32 %v11758_v8, 16  ;;  %v11764_v30 = vld [vmem:[%s12046_s22 + $0x8c] ss:$0 sps:$4 sm:$0x11]  }
  0x20   : > { %v627_v7 = vsel %vm290_vm2, %v622_v59, %v626_v60  ;;  %v690_v13 = vrot.slane %v688_v4, 1  ;;  %v750_v14 = vor.u32 %v749_v5, %v745_v62  ;;  %v754_v15 = vrot.slane %v752_v6, 1  ;;  %v11765_v35 = vld [vmem:[%s12046_s22 + $0x90] sm:$0xff]   ;;  %v11766_v44 = vld [vmem:[%s12046_s22 + $0x98] ss:$0 sps:$4 sm:$0x11]  }
  0x21   : > { %10369 = vmatmul.mubr.msk.bf16.vlgmr.msra.gmra.mrb[4].mxu0 %vm303_vm3, %v435_v47  ;;  %v809_v18 = vshrl.u32 %v11757_v63, 16  ;;  %v813_v19 = vrot.slane %v811_v10, 1  ;;  %v873_v21 = vshrl.u32 %v11759_v9, 16  ;;  %v880_v22 = vshll.u32 %v11760_v11, 16  ;;  %v11767_v45 = vld [vmem:[%s12046_s22 + $0x9c] sm:$0xff]   ;;  %v11769_v56 = vld [vmem:[%s12046_s22 + $0xa8] sm:$0xff]  }
  0x22   : > { %10375 = vmatmul.mubr.msk.bf16.vlgmr.msra.gmra.mrb[4].mxu1 %vm303_vm3, %v499_v49  ;;  %10379 = vmatpush3.bf16.msra.mxu0 %v12030_v2  ;;  %v691_v20 = vsel %vm290_vm2, %v686_v12, %v690_v13  ;;  %v755_v24 = vsel %vm290_vm2, %v750_v14, %v754_v15  ;;  %v877_v25 = vrot.slane %v875_v16, 1  ;;  %v818_v27 = vrot.slane %v816_v17, 1  ;;  %v11768_v47 = vld [vmem:[%s12046_s22 + $0xa4] ss:$0 sps:$4 sm:$0x11]   ;;  %v11771_v59 = vld [vmem:[%s12046_s22 + $0xb4] sm:$0xff]  }
  0x23   : > { %10385 = vmatpush3.bf16.msra.mxu1 %v12030_v2  ;;  %10380 = vmatprep.mubr.msk.bf16.mxu0 %vm11990_vm1, %v11989_v1  ;;  %v814_v28 = vor.u32 %v813_v19, %v809_v18  ;;  %v939_v31 = vshll.u32 %v11761_v23, 16  ;;  %v882_v33 = vrot.slane %v880_v22, 1  ;;  %v1003_v34 = vshll.u32 %v11763_v26, 16  ;;  %v11770_v63 = vld [vmem:[%s12046_s22 + $0xb0] ss:$0 sps:$4 sm:$0x11]  }
  0x24   : > { %10386 = vmatprep.mubr.msk.bf16.mxu1 %vm11990_vm1, %v11989_v1  ;;  %10390 = vmatprep.subr.bf16.mxu0 %v11989_v1  ;;  %v878_v32 = vor.u32 %v877_v25, %v873_v21  ;;  %v937_v37 = vshrl.u32 %v11761_v23, 16  ;;  %v944_v39 = vshll.u32 %v11762_v29, 16  ;;  %v1001_v40 = vshrl.u32 %v11763_v26, 16  ;;  %v231_v21 = vld [vmem:[%s13242_s1] sm:$0x3]  ;;  %v11774_v25 = vld [vmem:[%s12046_s22 + $0xc] sm:$0xff]  }
  0x25   : > { %10396 = vmatprep.subr.bf16.mxu1 %v11989_v1  ;;  %v819_v36 = vsel %vm290_vm2, %v814_v28, %v818_v27  ;;  %v941_v38 = vrot.slane %v939_v31, 1  ;;  %v1008_v41 = vshll.u32 %v11764_v30, 16  ;;  %v1005_v43 = vrot.slane %v1003_v34, 1  ;;  %v11775_v26 = vld [vmem:[%s12046_s22 + $0x18] sm:$0xff]   ;;  %v11776_v27 = vld [vmem:[%s12046_s22 + $0x24] sm:$0xff]   ;;  %v11777_v28 = vld [vmem:[%s12046_s22 + $0x30] sm:$0xff]  }
  0x26   : > { %v883_v42 = vsel %vm290_vm2, %v878_v32, %v882_v33  ;;  %v1067_v46 = vshll.u32 %v11765_v35, 16  ;;  %v946_v49 = vrot.slane %v944_v39, 1  ;;  %v1131_v52 = vshll.u32 %v11767_v45, 16  ;;  %v11778_v29 = vld [vmem:[%s12046_s22 + $0x3c] sm:$0xff]   ;;  %v11779_v30 = vld [vmem:[%s12046_s22 + $0x48] sm:$0xff]   ;;  %v11780_v31 = vld [vmem:[%s12046_s22 + $0x54] sm:$0xff]  }
  0x27   : > { %v942_v48 = vor.u32 %v941_v38, %v937_v37  ;;  %v1006_v50 = vor.u32 %v1005_v43, %v1001_v40  ;;  %v1010_v51 = vrot.slane %v1008_v41, 1  ;;  %v1065_v53 = vshrl.u32 %v11765_v35, 16  ;;  %v11781_v32 = vld [vmem:[%s12046_s22 + $0x60] sm:$0xff]   ;;  %v11782_v33 = vld [vmem:[%s12046_s22 + $0x6c] sm:$0xff]   ;;  %v11783_v34 = vld [vmem:[%s12046_s22 + $0x78] sm:$0xff]  }
  0x28   : > { %v1069_v54 = vrot.slane %v1067_v46, 1  ;;  %v1072_v55 = vshll.u32 %v11766_v44, 16  ;;  %v1129_v58 = vshrl.u32 %v11767_v45, 16  ;;  %v1133_v61 = vrot.slane %v1131_v52, 1  ;;  %v11784_v35 = vld [vmem:[%s12046_s22 + $0x84] sm:$0xff]   ;;  %v11786_v37 = vld [vmem:[%s12046_s22 + $0x9c] sm:$0xff]  }
  0x29   : > { %10381 = vmatmul.mubr.msk.bf16.vlgmr.msra.gmra.mrb[8].mxu0 %vm303_vm3, %v563_v0  ;;  %v947_v57 = vsel %vm290_vm2, %v942_v48, %v946_v49  ;;  %v1011_v60 = vsel %vm290_vm2, %v1006_v50, %v1010_v51  ;;  %v1136_v62 = vshll.u32 %v11768_v47, 16  ;;  %v11772_v0 = vld [vmem:[%s12046_s22 + $0xbc] ss:$0 sps:$4 sm:$0x11]   ;;  %v1195_v5 = vshll.u32 %v11769_v56, 16  ;;  %v11787_v40 = vld [vmem:[%s12046_s22 + $0xa8] sm:$0xff]  }
  0x2a   : > { %10387 = vmatmul.mubr.msk.bf16.vlgmr.msra.gmra.mrb[8].mxu1 %vm303_vm3, %v627_v7  ;;  %10391 = vmatpush3.bf16.msra.mxu0 %v12030_v2  ;;  %v1070_v3 = vor.u32 %v1069_v54, %v1065_v53  ;;  %v1074_v4 = vrot.slane %v1072_v55, 1  ;;  %v1134_v6 = vor.u32 %v1133_v61, %v1129_v58  ;;  %v1259_v8 = vshll.u32 %v11771_v59, 16  ;;  %v9335_v38 = vld [vmem:[%s13242_s1 + $0x4] sm:$0x3]  ;;  %v11788_v41 = vld [vmem:[%s12046_s22 + $0xb4] sm:$0xff]  }
  0x2b   : > { %10397 = vmatpush3.bf16.msra.mxu1 %v12030_v2  ;;  %10392 = vmatprep.mubr.msk.bf16.mxu0 %vm11990_vm1, %v11989_v1  ;;  %v1138_v7 = vrot.slane %v1136_v62, 1  ;;  %v1193_v9 = vshrl.u32 %v11769_v56, 16  ;;  %v1197_v11 = vrot.slane %v1195_v5, 1  ;;  %v1200_v12 = vshll.u32 %v11770_v63, 16  ;;  %v11791_v44 = vld [vmem:[%s12046_s22 + $0xc] sm:$0xfe]  }
  0x2c   : > { %10398 = vmatprep.mubr.msk.bf16.mxu1 %vm11990_vm1, %v11989_v1  ;;  %10402 = vmatprep.subr.bf16.mxu0 %v11989_v1  ;;  %v1075_v10 = vsel %vm290_vm2, %v1070_v3, %v1074_v4  ;;  %v1257_v13 = vshrl.u32 %v11771_v59, 16  ;;  %v1261_v15 = vrot.slane %v1259_v8, 1  ;;  %v1264_v16 = vshll.u32 %v11772_v0, 16  ;;  %v11790_v43 = vld [vmem:[%s12046_s22 + $0x8] ss:$0 sps:$4 sm:$0x11]  }
  0x2d   : > { %10408 = vmatprep.subr.bf16.mxu1 %v11989_v1  ;;  %v1139_v14 = vsel %vm290_vm2, %v1134_v6, %v1138_v7  ;;  %v1198_v17 = vor.u32 %v1197_v11, %v1193_v9  ;;  %v1202_v18 = vrot.slane %v1200_v12, 1  ;;  %v12170_v23 = vsel %vm307_vm0, %v231_v21, 0  ;;  %v11792_v45 = vld [vmem:[%s12046_s22 + $0x14] ss:$0 sps:$4 sm:$0x11]  }
  0x2e   : > { %v1262_v19 = vor.u32 %v1261_v15, %v1257_v13  ;;  %v12260_v39 = vsel %vm307_vm0, %v9335_v38, 0  ;;  %v2159_v47 = vrot.slane %v11790_v43, 1  ;;  %v2216_v48 = vrot.slane %v11791_v44, 1  ;;  %v11793_v50 = vld [vmem:[%s12046_s22 + $0x18] sm:$0xfe]  }
  0x2f   : > { %v2217_v49 = vrot.slane %v11792_v45, 1  ;;  %v11794_v51 = vld [vmem:[%s12046_s22 + $0x20] ss:$0 sps:$4 sm:$0x11]   ;;  %v11795_v55 = vld [vmem:[%s12046_s22 + $0x24] sm:$0xfe]  }
  0x30   : > { %v11796_v52 = vld [vmem:[%s12046_s22 + $0x2c] ss:$0 sps:$4 sm:$0x11]   ;;  %v2271_v56 = vrot.slane %v11793_v50, 1  ;;  %v2326_v58 = vrot.slane %v11795_v55, 1 }
  0x31   : > { %10393 = vmatmul.mubr.msk.bf16.vlgmr.msra.gmra.mrb[12].mxu0 %vm303_vm3, %v691_v20  ;;  %v1266_v20 = vrot.slane %v1264_v16, 1  ;;  %v2218_v54 = vsel %vm2157_vm4, %v2216_v48, %v2217_v49  ;;  %v2327_v59 = vrot.slane %v11796_v52, 1  ;;  %v11798_v61 = vld [vmem:[%s12046_s22 + $0x38] ss:$0 sps:$4 sm:$0x11]  }
  0x32   : > { %10399 = vmatmul.mubr.msk.bf16.vlgmr.msra.gmra.mrb[12].mxu1 %vm303_vm3, %v755_v24  ;;  %10403 = vmatpush3.bf16.msra.mxu0 %v12030_v2  ;;  %v11773_v24 = vld [vmem:[%s12046_s22] sm:$0xff]   ;;  %v2382_v5 = vrot.slane %v11798_v61, 1  ;;  %v11801_v8 = vld [vmem:[%s12046_s22 + $0x48] sm:$0xfe]   ;;  %v11803_v13 = vld [vmem:[%s12046_s22 + $0x54] sm:$0xfe]  }
  0x33   : > { %10409 = vmatpush3.bf16.msra.mxu1 %v12030_v2  ;;  %10404 = vmatprep.mubr.msk.bf16.mxu0 %vm11990_vm1, %v11989_v1  ;;  %v1267_v22 = vsel %vm290_vm2, %v1262_v19, %v1266_v20  ;;  %v11800_v62 = vld [vmem:[%s12046_s22 + $0x44] ss:$0 sps:$4 sm:$0x11]   ;;  %v2328_v0 = vsel %vm2157_vm4, %v2326_v58, %v2327_v59  ;;  %v11799_v3 = vld [vmem:[%s12046_s22 + $0x3c] sm:$0xfe]   ;;  %v2546_v16 = vrot.slane %v11803_v13, 1 }
  0x34   : > { %10410 = vmatprep.mubr.msk.bf16.mxu1 %vm11990_vm1, %v11989_v1  ;;  %10414 = vmatprep.subr.bf16.mxu0 %v11989_v1  ;;  %v2436_v6 = vrot.slane %v11799_v3, 1  ;;  %v2437_v7 = vrot.slane %v11800_v62, 1  ;;  %v11802_v9 = vld [vmem:[%s12046_s22 + $0x50] ss:$0 sps:$4 sm:$0x11]   ;;  %v11822_v62 = vld [vmem:[%s12046_s22 + $0x18] sm:$0xff]  }
  0x35   : > { %10420 = vmatprep.subr.bf16.mxu1 %v11989_v1  ;;  %v2492_v15 = vrot.slane %v11802_v9, 1  ;;  %v11806_v19 = vld [vmem:[%s12046_s22 + $0x68] ss:$0 sps:$4 sm:$0x11]   ;;  %v11815_v43 = vld [vmem:[%s12046_s22 + $0x9c] sm:$0xfe]  }
  0x36   : > { %v2438_v12 = vsel %vm2157_vm4, %v2436_v6, %v2437_v7  ;;  %v11808_v20 = vld [vmem:[%s12046_s22 + $0x74] ss:$0 sps:$4 sm:$0x11]   ;;  %v11814_v38 = vld [vmem:[%s12046_s22 + $0x98] ss:$0 sps:$4 sm:$0x11]  }
  0x37   : > { %v2822_v45 = vrot.slane %v11814_v38, 1  ;;  %v11817_v48 = vld [vmem:[%s12046_s22 + $0xa8] sm:$0xfe]   ;;  %v11818_v49 = vld [vmem:[%s12046_s22 + $0xb0] ss:$0 sps:$4 sm:$0x11]  }
  0x38   : > { %v11820_v50 = vld [vmem:[%s12046_s22 + $0xbc] ss:$0 sps:$4 sm:$0x11]   ;;  %v2932_v55 = vrot.slane %v11818_v49, 1  ;;  %v9416_v58 = vld [vmem:[%s13242_s1 + $0x6] sm:$0x3] }
  0x39   : > { %10405 = vmatmul.mubr.msk.bf16.vlgmr.msra.gmra.mrb[16].mxu0 %vm303_vm3, %v819_v36  ;;  %v11785_v36 = vld [vmem:[%s12046_s22 + $0x90] sm:$0xff]   ;;  %v11825_v3 = vld [vmem:[%s12046_s22 + $0x3c] sm:$0xff]   ;;  %v11831_v9 = vld [vmem:[%s12046_s22 + $0x84] sm:$0xff]  }
  0x3a   : > { %10411 = vmatmul.mubr.msk.bf16.vlgmr.msra.gmra.mrb[16].mxu1 %vm303_vm3, %v883_v42  ;;  %10415 = vmatpush3.bf16.msra.mxu0 %v12030_v2  ;;  %v11789_v42 = vld [vmem:[%s12046_s22] sm:$0xfe]   ;;  %v11821_v61 = vld [vmem:[%s12046_s22 + $0xc] sm:$0xff]  }
  0x3b   : > { %10421 = vmatpush3.bf16.msra.mxu1 %v12030_v2  ;;  %10416 = vmatprep.mubr.msk.bf16.mxu0 %vm11990_vm1, %v11989_v1  ;;  %v2158_v46 = vrot.slane %v11789_v42, 1  ;;  %v11828_v6 = vld [vmem:[%s12046_s22 + $0x60] sm:$0xff]   ;;  %v11829_v7 = vld [vmem:[%s12046_s22 + $0x6c] sm:$0xff]  }
  0x3c   : > { %10422 = vmatprep.mubr.msk.bf16.mxu1 %vm11990_vm1, %v11989_v1  ;;  %10426 = vmatprep.subr.bf16.mxu0 %v11989_v1  ;;  %v11837_v13 = vld [vmem:[%s12046_s22 + $0xc] sm:$0xff]  }
  0x3d   : > { %10432 = vmatprep.subr.bf16.mxu1 %v11989_v1  ;;  %v2160_v53 = vsel %vm2157_vm4, %v2158_v46, %v2159_v47  ;;  %v2876_v46 = vrot.slane %v11815_v43, 1  ;;  %v11845_v43 = vld [vmem:[%s12046_s22 + $0x3c] sm:$0xff]  }
  0x41   : > { %10417 = vmatmul.mubr.msk.bf16.vlgmr.msra.gmra.mrb[20].mxu0 %vm303_vm3, %v947_v57  ;;  %v2272_v57 = vrot.slane %v11794_v51, 1 }
  0x42   : > { %10423 = vmatmul.mubr.msk.bf16.vlgmr.msra.gmra.mrb[20].mxu1 %vm303_vm3, %v1011_v60  ;;  %10427 = vmatpush3.bf16.msra.mxu0 %v12030_v2  ;;  %v11797_v60 = vld [vmem:[%s12046_s22 + $0x30] sm:$0xfe]  }
  0x43   : > { %10433 = vmatpush3.bf16.msra.mxu1 %v12030_v2  ;;  %10428 = vmatprep.mubr.msk.bf16.mxu0 %vm11990_vm1, %v11989_v1  ;;  %v2273_v63 = vsel %vm2157_vm4, %v2271_v56, %v2272_v57  ;;  %v2381_v4 = vrot.slane %v11797_v60, 1  ;;  %v2987_v57 = vrot.slane %v11820_v50, 1  ;;  %v12406_v60 = vsel %vm307_vm0, %v9416_v58, 0 }
  0x44   : > { %10434 = vmatprep.mubr.msk.bf16.mxu1 %vm11990_vm1, %v11989_v1  ;;  %10438 = vmatprep.subr.bf16.mxu0 %v11989_v1  ;;  %v4237_v58 = vshrl.u32 %v11845_v43, 16 }
  0x45   : > { %10444 = vmatprep.subr.bf16.mxu1 %v11989_v1  ;;  %v2383_v11 = vsel %vm2157_vm4, %v2381_v4, %v2382_v5  ;;  %v11826_v4 = vld [vmem:[%s12046_s22 + $0x48] sm:$0xff]   ;;  %v11827_v5 = vld [vmem:[%s12046_s22 + $0x54] sm:$0xff]  }
  0x49   : > { %10429 = vmatmul.mubr.msk.bf16.vlgmr.msra.gmra.mrb[24].mxu0 %vm303_vm3, %v1075_v10  ;;  %v11804_v10 = vld [vmem:[%s12046_s22 + $0x5c] ss:$0 sps:$4 sm:$0x11]  }
  0x4a   : > { %10435 = vmatmul.mubr.msk.bf16.vlgmr.msra.gmra.mrb[24].mxu1 %vm303_vm3, %v1139_v14  ;;  %10439 = vmatpush3.bf16.msra.mxu0 %v12030_v2  ;;  %v2491_v14 = vrot.slane %v11801_v8, 1  ;;  %v11830_v8 = vld [vmem:[%s12046_s22 + $0x78] sm:$0xff]  }
  0x4b   : > { %10445 = vmatpush3.bf16.msra.mxu1 %v12030_v2  ;;  %10440 = vmatprep.mubr.msk.bf16.mxu0 %vm11990_vm1, %v11989_v1  ;;  %v1203_v2 = vsel %vm290_vm2, %v1198_v17, %v1202_v18  ;;  %v2547_v17 = vrot.slane %v11804_v10, 1  ;;  %v11805_v18 = vld [vmem:[%s12046_s22 + $0x60] sm:$0xfe]   ;;  %v11832_v10 = vld [vmem:[%s12046_s22 + $0x90] sm:$0xff]  }
  0x4c   : > { %10446 = vmatprep.mubr.msk.bf16.mxu1 %vm11990_vm1, %v11989_v1  ;;  %10450 = vmatprep.subr.bf16.mxu0 %v11989_v1  ;;  %v2493_v21 = vsel %vm2157_vm4, %v2491_v14, %v2492_v15  ;;  %v11839_v14 = vld [vmem:[%s12046_s22 + $0x18] sm:$0xff]   ;;  %v11838_v15 = vld [vmem:[%s12046_s22 + $0x14] ss:$0 sps:$4 sm:$0x11]  }
  0x4d   : > { %10456 = vmatprep.subr.bf16.mxu1 %v11989_v1 }
  0x51   : > { %10441 = vmatmul.mubr.msk.bf16.vlgmr.msra.gmra.mrb[28].mxu0 %vm303_vm3, %v1203_v2  ;;  %v2548_v2 = vsel %vm2157_vm4, %v2546_v16, %v2547_v17  ;;  %v3980_v16 = vshll.u32 %v11837_v13, 16  ;;  %v11840_v17 = vld [vmem:[%s12046_s22 + $0x20] ss:$0 sps:$4 sm:$0x11]  }
  0x52   : > { %10447 = vmatmul.mubr.msk.bf16.vlgmr.msra.gmra.mrb[28].mxu1 %vm303_vm3, %v1267_v22  ;;  %10451 = vmatpush3.bf16.msra.mxu0 %v12170_v23  ;;  %v11807_v22 = vld [vmem:[%s12046_s22 + $0x6c] sm:$0xfe]  }
  0x53   : > { %10457 = vmatpush3.bf16.msra.mxu1 %v12170_v23  ;;  %10452 = vmatprep.mubr.msk.bf16.mxu0 %vm11990_vm1, %v11989_v1 }
  0x54   : > { %10458 = vmatprep.mubr.msk.bf16.mxu1 %vm11990_vm1, %v11989_v1  ;;  %10462 = vmatprep.subr.bf16.mxu0 %v11989_v1 }
  0x55   : > { %10468 = vmatprep.subr.bf16.mxu1 %v11989_v1 }
  0x59   : > { %10453 = vmatmul.mubr.msk.bf16.vlgmr.msra.gmra.mrb[0].mxu0 %vm303_vm3, %v11773_v24  ;;  %v2602_v24 = vrot.slane %v11806_v19, 1  ;;  %v9497_v19 = vld [vmem:[%s13242_s1 + $0x8] sm:$0x3] }
  0x5a   : > { %10459 = vmatmul.mubr.msk.bf16.vlgmr.msra.gmra.mrb[0].mxu1 %vm303_vm3, %v11774_v25  ;;  %10463 = vmatpush3.bf16.msra.mxu0 %v12170_v23  ;;  %v2656_v25 = vrot.slane %v11807_v22, 1  ;;  %v3982_v22 = vrot.slane %v3980_v16, 1  ;;  %v11853_v16 = vld [vmem:[%s12046_s22 + $0x6c] sm:$0xff]  }
  0x5b   : > { %10469 = vmatpush3.bf16.msra.mxu1 %v12170_v23  ;;  %10464 = vmatprep.mubr.msk.bf16.mxu0 %vm11990_vm1, %v11989_v1 }
  0x5c   : > { %10470 = vmatprep.mubr.msk.bf16.mxu1 %vm11990_vm1, %v11989_v1  ;;  %10474 = vmatprep.subr.bf16.mxu0 %v11989_v1 }
  0x5d   : > { %10480 = vmatprep.subr.bf16.mxu1 %v11989_v1 }
  0x61   : > { %10465 = vmatmul.mubr.msk.bf16.vlgmr.msra.gmra.mrb[4].mxu0 %vm303_vm3, %v11775_v26  ;;  %v2657_v26 = vrot.slane %v11808_v20, 1  ;;  %v11835_v20 = vld [vmem:[%s12046_s22 + $0xb4] sm:$0xff]  }
  0x62   : > { %10471 = vmatmul.mubr.msk.bf16.vlgmr.msra.gmra.mrb[4].mxu1 %vm303_vm3, %v11776_v27  ;;  %10475 = vmatpush3.bf16.msra.mxu0 %v12170_v23  ;;  %v11809_v27 = vld [vmem:[%s12046_s22 + $0x78] sm:$0xfe]  }
  0x63   : > { %10481 = vmatpush3.bf16.msra.mxu1 %v12170_v23  ;;  %10476 = vmatprep.mubr.msk.bf16.mxu0 %vm11990_vm1, %v11989_v1 }
  0x64   : > { %10482 = vmatprep.mubr.msk.bf16.mxu1 %vm11990_vm1, %v11989_v1  ;;  %10486 = vmatprep.subr.bf16.mxu0 %v11989_v1 }
  0x65   : > { %10492 = vmatprep.subr.bf16.mxu1 %v11989_v1 }
  0x69   : > { %10477 = vmatmul.mubr.msk.bf16.vlgmr.msra.gmra.mrb[8].mxu0 %vm303_vm3, %v11777_v28  ;;  %v11810_v28 = vld [vmem:[%s12046_s22 + $0x80] ss:$0 sps:$4 sm:$0x11]  }
  0x6a   : > { %10483 = vmatmul.mubr.msk.bf16.vlgmr.msra.gmra.mrb[8].mxu1 %vm303_vm3, %v11778_v29  ;;  %10487 = vmatpush3.bf16.msra.mxu0 %v12170_v23  ;;  %v11812_v29 = vld [vmem:[%s12046_s22 + $0x8c] ss:$0 sps:$4 sm:$0x11]  }
  0x6b   : > { %10493 = vmatpush3.bf16.msra.mxu1 %v12170_v23  ;;  %10488 = vmatprep.mubr.msk.bf16.mxu0 %vm11990_vm1, %v11989_v1 }
  0x6c   : > { %10494 = vmatprep.mubr.msk.bf16.mxu1 %vm11990_vm1, %v11989_v1  ;;  %10498 = vmatprep.subr.bf16.mxu0 %v11989_v1 }
  0x6d   : > { %10504 = vmatprep.subr.bf16.mxu1 %v11989_v1 }
  0x71   : > { %10489 = vmatmul.mubr.msk.bf16.vlgmr.msra.gmra.mrb[12].mxu0 %vm303_vm3, %v11779_v30 }
  0x72   : > { %10495 = vmatmul.mubr.msk.bf16.vlgmr.msra.gmra.mrb[12].mxu1 %vm303_vm3, %v11780_v31  ;;  %10499 = vmatpush3.bf16.msra.mxu0 %v12170_v23  ;;  %v2658_v31 = vsel %vm2157_vm4, %v2656_v25, %v2657_v26  ;;  %v12513_v25 = vsel %vm307_vm0, %v9497_v19, 0  ;;  %v4045_v26 = vshrl.u32 %v11839_v14, 16 }
  0x73   : > { %10505 = vmatpush3.bf16.msra.mxu1 %v12170_v23  ;;  %10500 = vmatprep.mubr.msk.bf16.mxu0 %vm11990_vm1, %v11989_v1 }
  0x74   : > { %10506 = vmatprep.mubr.msk.bf16.mxu1 %vm11990_vm1, %v11989_v1  ;;  %10510 = vmatprep.subr.bf16.mxu0 %v11989_v1 }
  0x75   : > { %10516 = vmatprep.subr.bf16.mxu1 %v11989_v1 }
  0x79   : > { %10501 = vmatmul.mubr.msk.bf16.vlgmr.msra.gmra.mrb[16].mxu0 %vm303_vm3, %v11781_v32  ;;  %v11811_v32 = vld [vmem:[%s12046_s22 + $0x84] sm:$0xfe]  }
  0x7a   : > { %10507 = vmatmul.mubr.msk.bf16.vlgmr.msra.gmra.mrb[16].mxu1 %vm303_vm3, %v11782_v33  ;;  %10511 = vmatpush3.bf16.msra.mxu0 %v12170_v23  ;;  %v2711_v33 = vrot.slane %v11809_v27, 1 }
  0x7b   : > { %10517 = vmatpush3.bf16.msra.mxu1 %v12170_v23  ;;  %10512 = vmatprep.mubr.msk.bf16.mxu0 %vm11990_vm1, %v11989_v1 }
  0x7c   : > { %10518 = vmatprep.mubr.msk.bf16.mxu1 %vm11990_vm1, %v11989_v1  ;;  %10522 = vmatprep.subr.bf16.mxu0 %v11989_v1 }
  0x7d   : > { %10528 = vmatprep.subr.bf16.mxu1 %v11989_v1 }
  0x81   : > { %10513 = vmatmul.mubr.msk.bf16.vlgmr.msra.gmra.mrb[20].mxu0 %vm303_vm3, %v11783_v34  ;;  %v2712_v34 = vrot.slane %v11810_v28, 1  ;;  %v4052_v28 = vshll.u32 %v11840_v17, 16 }
  0x82   : > { %10519 = vmatmul.mubr.msk.bf16.vlgmr.msra.gmra.mrb[20].mxu1 %vm303_vm3, %v11784_v35  ;;  %10523 = vmatpush3.bf16.msra.mxu0 %v12170_v23  ;;  %v2766_v35 = vrot.slane %v11811_v32, 1  ;;  %v11842_v32 = vld [vmem:[%s12046_s22 + $0x2c] ss:$0 sps:$4 sm:$0x11]  }
  0x83   : > { %10529 = vmatpush3.bf16.msra.mxu1 %v12170_v23  ;;  %10524 = vmatprep.mubr.msk.bf16.mxu0 %vm11990_vm1, %v11989_v1 }
  0x84   : > { %10530 = vmatprep.mubr.msk.bf16.mxu1 %vm11990_vm1, %v11989_v1  ;;  %10534 = vmatprep.subr.bf16.mxu0 %v11989_v1 }
  0x85   : > { %10540 = vmatprep.subr.bf16.mxu1 %v11989_v1 }
  0x89   : > { %10525 = vmatmul.mubr.msk.bf16.vlgmr.msra.gmra.mrb[24].mxu0 %vm303_vm3, %v11785_v36  ;;  %v2767_v36 = vrot.slane %v11812_v29, 1  ;;  %v11843_v29 = vld [vmem:[%s12046_s22 + $0x30] sm:$0xff]  }
  0x8a   : > { %10531 = vmatmul.mubr.msk.bf16.vlgmr.msra.gmra.mrb[24].mxu1 %vm303_vm3, %v11786_v37  ;;  %10535 = vmatpush3.bf16.msra.mxu0 %v12170_v23  ;;  %v11813_v37 = vld [vmem:[%s12046_s22 + $0x90] sm:$0xfe]  }
  0x8b   : > { %10541 = vmatpush3.bf16.msra.mxu1 %v12170_v23  ;;  %10536 = vmatprep.mubr.msk.bf16.mxu0 %vm11990_vm1, %v11989_v1  ;;  %v2601_v23 = vrot.slane %v11805_v18, 1  ;;  %v2768_v42 = vsel %vm2157_vm4, %v2766_v35, %v2767_v36  ;;  %v2821_v44 = vrot.slane %v11813_v37, 1  ;;  %v4047_v18 = vshll.u32 %v11839_v14, 16  ;;  %v11844_v36 = vld [vmem:[%s12046_s22 + $0x38] ss:$0 sps:$4 sm:$0x11]  }
  0x8c   : > { %10542 = vmatprep.mubr.msk.bf16.mxu1 %vm11990_vm1, %v11989_v1  ;;  %10546 = vmatprep.subr.bf16.mxu0 %v11989_v1  ;;  %v4054_v35 = vrot.slane %v4052_v28, 1  ;;  %v4175_v37 = vshll.u32 %v11843_v29, 16  ;;  %v11856_v28 = vld [vmem:[%s12046_s22 + $0x80] ss:$0 sps:$4 sm:$0x11]  }
  0x8d   : > { %10552 = vmatprep.subr.bf16.mxu1 %v11989_v1  ;;  %v2603_v30 = vsel %vm2157_vm4, %v2601_v23, %v2602_v24  ;;  %v2823_v51 = vsel %vm2157_vm4, %v2821_v44, %v2822_v45  ;;  %v3985_v23 = vshll.u32 %v11838_v15, 16  ;;  %v11841_v24 = vld [vmem:[%s12046_s22 + $0x24] sm:$0xff]   ;;  %v4049_v27 = vrot.slane %v4047_v18, 1 }
  0x8e   : > { %v4173_v45 = vshrl.u32 %v11843_v29, 16 }
  0x91   : > { %10537 = vmatmul.mubr.msk.bf16.vlgmr.msra.gmra.mrb[28].mxu0 %vm303_vm3, %v11787_v40  ;;  %v11816_v40 = vld [vmem:[%s12046_s22 + $0xa4] ss:$0 sps:$4 sm:$0x11]  }
  0x92   : > { %10543 = vmatmul.mubr.msk.bf16.vlgmr.msra.gmra.mrb[28].mxu1 %vm303_vm3, %v11788_v41  ;;  %10547 = vmatpush3.bf16.msra.mxu0 %v12260_v39  ;;  %v2713_v41 = vsel %vm2157_vm4, %v2711_v33, %v2712_v34  ;;  %v2877_v47 = vrot.slane %v11816_v40, 1  ;;  %v4111_v33 = vshll.u32 %v11841_v24, 16  ;;  %v4050_v34 = vor.u32 %v4049_v27, %v4045_v26 }
  0x93   : > { %10553 = vmatpush3.bf16.msra.mxu1 %v12260_v39  ;;  %10548 = vmatprep.mubr.msk.bf16.mxu0 %vm11990_vm1, %v11989_v1  ;;  %v4109_v40 = vshrl.u32 %v11841_v24, 16  ;;  %v4495_v24 = vshll.u32 %v11853_v16, 16 }
  0x94   : > { %10554 = vmatprep.mubr.msk.bf16.mxu1 %vm11990_vm1, %v11989_v1  ;;  %10558 = vmatprep.subr.bf16.mxu0 %v11989_v1  ;;  %v2878_v52 = vsel %vm2157_vm4, %v2876_v46, %v2877_v47  ;;  %v4055_v44 = vsel %vm290_vm2, %v4050_v34, %v4054_v35  ;;  %v4177_v46 = vrot.slane %v4175_v37, 1  ;;  %v4180_v47 = vshll.u32 %v11844_v36, 16  ;;  %v11857_v34 = vld [vmem:[%s12046_s22 + $0x84] sm:$0xff]  }
  0x95   : > { %10564 = vmatprep.subr.bf16.mxu1 %v11989_v1 }
  0x99   : > { %10549 = vmatmul.mubr.msk.bf16.vlgmr.msra.gmra.mrb[0].mxu0 %vm303_vm3, %v2160_v53  ;;  %v11819_v53 = vld [vmem:[%s12046_s22 + $0xb4] sm:$0xfe]  }
  0x9a   : > { %10555 = vmatmul.mubr.msk.bf16.vlgmr.msra.gmra.mrb[0].mxu1 %vm303_vm3, %v2218_v54  ;;  %10559 = vmatpush3.bf16.msra.mxu0 %v12260_v39  ;;  %v2931_v54 = vrot.slane %v11817_v48, 1  ;;  %v2986_v56 = vrot.slane %v11819_v53, 1  ;;  %v11847_v48 = vld [vmem:[%s12046_s22 + $0x48] sm:$0xff]   ;;  %v4178_v53 = vor.u32 %v4177_v46, %v4173_v45 }
  0x9b   : > { %10565 = vmatpush3.bf16.msra.mxu1 %v12260_v39  ;;  %10560 = vmatprep.mubr.msk.bf16.mxu0 %vm11990_vm1, %v11989_v1 }
  0x9c   : > { %10566 = vmatprep.mubr.msk.bf16.mxu1 %vm11990_vm1, %v11989_v1  ;;  %10570 = vmatprep.subr.bf16.mxu0 %v11989_v1  ;;  %v2988_v59 = vsel %vm2157_vm4, %v2986_v56, %v2987_v57  ;;  %v4303_v56 = vshll.u32 %v11847_v48, 16 }
  0x9d   : > { %10576 = vmatprep.subr.bf16.mxu1 %v11989_v1 }
  0xa1   : > { %10561 = vmatmul.mubr.msk.bf16.vlgmr.msra.gmra.mrb[4].mxu0 %vm303_vm3, %v2273_v63  ;;  %v11823_v63 = vld [vmem:[%s12046_s22 + $0x24] sm:$0xff]  }
  0xa2   : > { %10567 = vmatmul.mubr.msk.bf16.vlgmr.msra.gmra.mrb[4].mxu1 %vm303_vm3, %v2328_v0  ;;  %10571 = vmatpush3.bf16.msra.mxu0 %v12260_v39  ;;  %v11824_v0 = vld [vmem:[%s12046_s22 + $0x30] sm:$0xff]  }
  0xa3   : > { %10577 = vmatpush3.bf16.msra.mxu1 %v12260_v39  ;;  %10572 = vmatprep.mubr.msk.bf16.mxu0 %vm11990_vm1, %v11989_v1 }
  0xa4   : > { %10578 = vmatprep.mubr.msk.bf16.mxu1 %vm11990_vm1, %v11989_v1  ;;  %10582 = vmatprep.subr.bf16.mxu0 %v11989_v1 }
  0xa5   : > { %10588 = vmatprep.subr.bf16.mxu1 %v11989_v1 }
  0xa9   : > { %10573 = vmatmul.mubr.msk.bf16.vlgmr.msra.gmra.mrb[8].mxu0 %vm303_vm3, %v2383_v11  ;;  %v11833_v11 = vld [vmem:[%s12046_s22 + $0x9c] sm:$0xff]  }
  0xaa   : > { %10579 = vmatmul.mubr.msk.bf16.vlgmr.msra.gmra.mrb[8].mxu1 %vm303_vm3, %v2438_v12  ;;  %10583 = vmatpush3.bf16.msra.mxu0 %v12260_v39  ;;  %v11834_v12 = vld [vmem:[%s12046_s22 + $0xa8] sm:$0xff]  }
  0xab   : > { %10589 = vmatpush3.bf16.msra.mxu1 %v12260_v39  ;;  %10584 = vmatprep.mubr.msk.bf16.mxu0 %vm11990_vm1, %v11989_v1 }
  0xac   : > { %10590 = vmatprep.mubr.msk.bf16.mxu1 %vm11990_vm1, %v11989_v1  ;;  %10594 = vmatprep.subr.bf16.mxu0 %v11989_v1 }
  0xad   : > { %10600 = vmatprep.subr.bf16.mxu1 %v11989_v1 }
  0xb1   : > { %10585 = vmatmul.mubr.msk.bf16.vlgmr.msra.gmra.mrb[12].mxu0 %vm303_vm3, %v2493_v21  ;;  %v11836_v21 = vld [vmem:[%s12046_s22 + $0xc0] sm:$0xff]  }
  0xb2   : > { %10591 = vmatmul.mubr.msk.bf16.vlgmr.msra.gmra.mrb[12].mxu1 %vm303_vm3, %v2548_v2  ;;  %10595 = vmatpush3.bf16.msra.mxu0 %v12260_v39  ;;  %v3978_v2 = vshrl.u32 %v11837_v13, 16 }
  0xb3   : > { %10601 = vmatpush3.bf16.msra.mxu1 %v12260_v39  ;;  %10596 = vmatprep.mubr.msk.bf16.mxu0 %vm11990_vm1, %v11989_v1 }
  0xb4   : > { %10602 = vmatprep.mubr.msk.bf16.mxu1 %vm11990_vm1, %v11989_v1  ;;  %10606 = vmatprep.subr.bf16.mxu0 %v11989_v1 }
  0xb5   : > { %10612 = vmatprep.subr.bf16.mxu1 %v11989_v1 }
  0xb9   : > { %10597 = vmatmul.mubr.msk.bf16.vlgmr.msra.gmra.mrb[16].mxu0 %vm303_vm3, %v2603_v30  ;;  %v3983_v30 = vor.u32 %v3982_v22, %v3978_v2 }
  0xba   : > { %10603 = vmatmul.mubr.msk.bf16.vlgmr.msra.gmra.mrb[16].mxu1 %vm303_vm3, %v2658_v31  ;;  %10607 = vmatpush3.bf16.msra.mxu0 %v12260_v39  ;;  %v3987_v31 = vrot.slane %v3985_v23, 1  ;;  %v11854_v23 = vld [vmem:[%s12046_s22 + $0x74] ss:$0 sps:$4 sm:$0x11]  }
  0xbb   : > { %10613 = vmatpush3.bf16.msra.mxu1 %v12260_v39  ;;  %10608 = vmatprep.mubr.msk.bf16.mxu0 %vm11990_vm1, %v11989_v1 }
  0xbc   : > { %10614 = vmatprep.mubr.msk.bf16.mxu1 %vm11990_vm1, %v11989_v1  ;;  %10618 = vmatprep.subr.bf16.mxu0 %v11989_v1  ;;  %v3988_v38 = vsel %vm290_vm2, %v3983_v30, %v3987_v31  ;;  %v4493_v31 = vshrl.u32 %v11853_v16, 16  ;;  %v11866_v16 = vld [vmem:[%s12046_s22 + $0xbc] ss:$0 sps:$4 sm:$0x11]  }
  0xbd   : > { %10624 = vmatprep.subr.bf16.mxu1 %v11989_v1 }
  0xc1   : > { %10609 = vmatmul.mubr.msk.bf16.vlgmr.msra.gmra.mrb[20].mxu0 %vm303_vm3, %v2713_v41  ;;  %v4113_v41 = vrot.slane %v4111_v33, 1  ;;  %v4500_v33 = vshll.u32 %v11854_v23, 16 }
  0xc2   : > { %10615 = vmatmul.mubr.msk.bf16.vlgmr.msra.gmra.mrb[20].mxu1 %vm303_vm3, %v2768_v42  ;;  %10619 = vmatpush3.bf16.msra.mxu0 %v12260_v39  ;;  %v4116_v42 = vshll.u32 %v11842_v32, 16  ;;  %v4497_v32 = vrot.slane %v4495_v24, 1  ;;  %v4884_v24 = vshll.u32 %v11866_v16, 16 }
  0xc3   : > { %10625 = vmatpush3.bf16.msra.mxu1 %v12260_v39  ;;  %10620 = vmatprep.mubr.msk.bf16.mxu0 %vm11990_vm1, %v11989_v1  ;;  %v4114_v49 = vor.u32 %v4113_v41, %v4109_v40  ;;  %v11859_v40 = vld [vmem:[%s12046_s22 + $0x90] sm:$0xff]  }
  0xc4   : > { %10626 = vmatprep.mubr.msk.bf16.mxu1 %vm11990_vm1, %v11989_v1  ;;  %10630 = vmatprep.subr.bf16.mxu0 %v11989_v1  ;;  %v4118_v50 = vrot.slane %v4116_v42, 1  ;;  %v4498_v41 = vor.u32 %v4497_v32, %v4493_v31  ;;  %v4502_v42 = vrot.slane %v4500_v33, 1  ;;  %v4886_v31 = vrot.slane %v4884_v24, 1  ;;  %v11890_v24 = vld [vmem:[%s12046_s22 + $0x8c] ss:$0 sps:$4 sm:$0x11]  }
  0xc5   : > { %10636 = vmatprep.subr.bf16.mxu1 %v11989_v1 }
  0xc6   : > { %v4119_v57 = vsel %vm290_vm2, %v4114_v49, %v4118_v50  ;;  %v4503_v49 = vsel %vm290_vm2, %v4498_v41, %v4502_v42  ;;  %v4621_v50 = vshrl.u32 %v11857_v34, 16  ;;  %v11872_v41 = vld [vmem:[%s12046_s22 + $0x20] ss:$0 sps:$4 sm:$0x11]  }
  0xc9   : > { %10621 = vmatmul.mubr.msk.bf16.vlgmr.msra.gmra.mrb[24].mxu0 %vm303_vm3, %v2823_v51  ;;  %v11846_v51 = vld [vmem:[%s12046_s22 + $0x44] ss:$0 sps:$4 sm:$0x11]  }
  0xca   : > { %10627 = vmatmul.mubr.msk.bf16.vlgmr.msra.gmra.mrb[24].mxu1 %vm303_vm3, %v2878_v52  ;;  %10631 = vmatpush3.bf16.msra.mxu0 %v12260_v39  ;;  %v4239_v52 = vshll.u32 %v11845_v43, 16  ;;  %v11858_v43 = vld [vmem:[%s12046_s22 + $0x8c] ss:$0 sps:$4 sm:$0x11]  }
  0xcb   : > { %10637 = vmatpush3.bf16.msra.mxu1 %v12260_v39  ;;  %10632 = vmatprep.mubr.msk.bf16.mxu0 %vm11990_vm1, %v11989_v1  ;;  %v2933_v39 = vsel %vm2157_vm4, %v2931_v54, %v2932_v55  ;;  %v4182_v54 = vrot.slane %v4180_v47, 1  ;;  %v11848_v55 = vld [vmem:[%s12046_s22 + $0x50] ss:$0 sps:$4 sm:$0x11]  }
  0xcc   : > { %10638 = vmatprep.mubr.msk.bf16.mxu1 %vm11990_vm1, %v11989_v1  ;;  %10642 = vmatprep.subr.bf16.mxu0 %v11989_v1  ;;  %v11860_v47 = vld [vmem:[%s12046_s22 + $0x98] ss:$0 sps:$4 sm:$0x11]  }
  0xcd   : > { %10648 = vmatprep.subr.bf16.mxu1 %v11989_v1 }
  0xd1   : > { %10633 = vmatmul.mubr.msk.bf16.vlgmr.msra.gmra.mrb[28].mxu0 %vm303_vm3, %v2933_v39  ;;  %v4241_v39 = vrot.slane %v4239_v52, 1  ;;  %v4628_v52 = vshll.u32 %v11858_v43, 16 }
  0xd2   : > { %10639 = vmatmul.mubr.msk.bf16.vlgmr.msra.gmra.mrb[28].mxu1 %vm303_vm3, %v2988_v59  ;;  %10643 = vmatpush3.bf16.msra.mxu0 %v12406_v60  ;;  %v4244_v59 = vshll.u32 %v11846_v51, 16 }
  0xd3   : > { %10649 = vmatpush3.bf16.msra.mxu1 %v12406_v60  ;;  %10644 = vmatprep.mubr.msk.bf16.mxu0 %vm11990_vm1, %v11989_v1 }
  0xd4   : > { %10650 = vmatprep.mubr.msk.bf16.mxu1 %vm11990_vm1, %v11989_v1  ;;  %10654 = vmatprep.subr.bf16.mxu0 %v11989_v1 }
  0xd5   : > { %10660 = vmatprep.subr.bf16.mxu1 %v11989_v1 }
  0xd9   : > { %10645 = vmatmul.mubr.msk.bf16.vlgmr.msra.gmra.mrb[0].mxu0 %vm303_vm3, %v11821_v61  ;;  %v4183_v61 = vsel %vm290_vm2, %v4178_v53, %v4182_v54  ;;  %v11861_v53 = vld [vmem:[%s12046_s22 + $0x9c] sm:$0xff]  }
  0xda   : > { %10651 = vmatmul.mubr.msk.bf16.vlgmr.msra.gmra.mrb[0].mxu1 %vm303_vm3, %v11822_v62  ;;  %10655 = vmatpush3.bf16.msra.mxu0 %v12406_v60  ;;  %v4301_v62 = vshrl.u32 %v11847_v48, 16  ;;  %v4687_v48 = vshll.u32 %v11859_v40, 16 }
  0xdb   : > { %10661 = vmatpush3.bf16.msra.mxu1 %v12406_v60  ;;  %10656 = vmatprep.mubr.msk.bf16.mxu0 %vm11990_vm1, %v11989_v1 }
  0xdc   : > { %10662 = vmatprep.mubr.msk.bf16.mxu1 %vm11990_vm1, %v11989_v1  ;;  %10666 = vmatprep.subr.bf16.mxu0 %v11989_v1 }
  0xdd   : > { %10672 = vmatprep.subr.bf16.mxu1 %v11989_v1 }
  0xe1   : > { %10657 = vmatmul.mubr.msk.bf16.vlgmr.msra.gmra.mrb[4].mxu0 %vm303_vm3, %v11823_v63  ;;  %v4305_v63 = vrot.slane %v4303_v56, 1  ;;  %v4689_v56 = vrot.slane %v4687_v48, 1  ;;  %v11874_v48 = vld [vmem:[%s12046_s22 + $0x2c] ss:$0 sps:$4 sm:$0x11]  }
  0xe2   : > { %10663 = vmatmul.mubr.msk.bf16.vlgmr.msra.gmra.mrb[4].mxu1 %vm303_vm3, %v11824_v0  ;;  %10667 = vmatpush3.bf16.msra.mxu0 %v12406_v60  ;;  %v4308_v0 = vshll.u32 %v11848_v55, 16  ;;  %v4685_v55 = vshrl.u32 %v11859_v40, 16  ;;  %v11871_v40 = vld [vmem:[%s12046_s22 + $0x18] sm:$0xfe]  }
  0xe3   : > { %10673 = vmatpush3.bf16.msra.mxu1 %v12406_v60  ;;  %10668 = vmatprep.mubr.msk.bf16.mxu0 %vm11990_vm1, %v11989_v1 }
  0xe4   : > { %10674 = vmatprep.mubr.msk.bf16.mxu1 %vm11990_vm1, %v11989_v1  ;;  %10678 = vmatprep.subr.bf16.mxu0 %v11989_v1 }
  0xe5   : > { %10684 = vmatprep.subr.bf16.mxu1 %v11989_v1 }
  0xe9   : > { %10669 = vmatmul.mubr.msk.bf16.vlgmr.msra.gmra.mrb[8].mxu0 %vm303_vm3, %v11825_v3  ;;  %v11851_v3 = vld [vmem:[%s12046_s22 + $0x60] sm:$0xff]  }
  0xea   : > { %10675 = vmatmul.mubr.msk.bf16.vlgmr.msra.gmra.mrb[8].mxu1 %vm303_vm3, %v11826_v4  ;;  %10679 = vmatpush3.bf16.msra.mxu0 %v12406_v60  ;;  %v4242_v4 = vor.u32 %v4241_v39, %v4237_v58  ;;  %v4429_v18 = vshrl.u32 %v11851_v3, 16  ;;  %v11863_v58 = vld [vmem:[%s12046_s22 + $0xa8] sm:$0xff]  }
  0xeb   : > { %10685 = vmatpush3.bf16.msra.mxu1 %v12406_v60  ;;  %10680 = vmatprep.mubr.msk.bf16.mxu0 %vm11990_vm1, %v11989_v1 }
  0xec   : > { %10686 = vmatprep.mubr.msk.bf16.mxu1 %vm11990_vm1, %v11989_v1  ;;  %10690 = vmatprep.subr.bf16.mxu0 %v11989_v1 }
  0xed   : > { %10696 = vmatprep.subr.bf16.mxu1 %v11989_v1 }
  0xf1   : > { %10681 = vmatmul.mubr.msk.bf16.vlgmr.msra.gmra.mrb[12].mxu0 %vm303_vm3, %v11827_v5  ;;  %v4246_v5 = vrot.slane %v4244_v59, 1  ;;  %v4630_v59 = vrot.slane %v4628_v52, 1 }
  0xf2   : > { %10687 = vmatmul.mubr.msk.bf16.vlgmr.msra.gmra.mrb[12].mxu1 %vm303_vm3, %v11828_v6  ;;  %10691 = vmatpush3.bf16.msra.mxu0 %v12406_v60  ;;  %v11850_v6 = vld [vmem:[%s12046_s22 + $0x5c] ss:$0 sps:$4 sm:$0x11]  }
  0xf3   : > { %10697 = vmatpush3.bf16.msra.mxu1 %v12406_v60  ;;  %10692 = vmatprep.mubr.msk.bf16.mxu0 %vm11990_vm1, %v11989_v1  ;;  %v4372_v15 = vshll.u32 %v11850_v6, 16 }
  0xf4   : > { %10698 = vmatprep.mubr.msk.bf16.mxu1 %vm11990_vm1, %v11989_v1  ;;  %10702 = vmatprep.subr.bf16.mxu0 %v11989_v1 }
  0xf5   : > { %10708 = vmatprep.subr.bf16.mxu1 %v11989_v1  ;;  %v4374_v22 = vrot.slane %v4372_v15, 1 }
  0xf9   : > { %10693 = vmatmul.mubr.msk.bf16.vlgmr.msra.gmra.mrb[16].mxu0 %vm303_vm3, %v11829_v7 }
  0xfa   : > { %10699 = vmatmul.mubr.msk.bf16.vlgmr.msra.gmra.mrb[16].mxu1 %vm303_vm3, %v11830_v8  ;;  %10703 = vmatpush3.bf16.msra.mxu0 %v12406_v60  ;;  %v4306_v8 = vor.u32 %v4305_v63, %v4301_v62  ;;  %v4690_v62 = vor.u32 %v4689_v56, %v4685_v55 }
  0xfb   : > { %10709 = vmatpush3.bf16.msra.mxu1 %v12406_v60  ;;  %10704 = vmatprep.mubr.msk.bf16.mxu0 %vm11990_vm1, %v11989_v1 }
  0xfc   : > { %10710 = vmatprep.mubr.msk.bf16.mxu1 %vm11990_vm1, %v11989_v1  ;;  %10714 = vmatprep.subr.bf16.mxu0 %v11989_v1 }
  0xfd   : > { %10720 = vmatprep.subr.bf16.mxu1 %v11989_v1 }
 0x101   : > { %10705 = vmatmul.mubr.msk.bf16.vlgmr.msra.gmra.mrb[20].mxu0 %vm303_vm3, %v11831_v9  ;;  %v4310_v9 = vrot.slane %v4308_v0, 1  ;;  %v11864_v0 = vld [vmem:[%s12046_s22 + $0xb0] ss:$0 sps:$4 sm:$0x11]  }
 0x102   : > { %10711 = vmatmul.mubr.msk.bf16.vlgmr.msra.gmra.mrb[20].mxu1 %vm303_vm3, %v11832_v10  ;;  %10715 = vmatpush3.bf16.msra.mxu0 %v12406_v60  ;;  %v11852_v10 = vld [vmem:[%s12046_s22 + $0x68] ss:$0 sps:$4 sm:$0x11]  }
 0x103   : > { %10721 = vmatpush3.bf16.msra.mxu1 %v12406_v60  ;;  %10716 = vmatprep.mubr.msk.bf16.mxu0 %vm11990_vm1, %v11989_v1  ;;  %v4311_v17 = vsel %vm290_vm2, %v4306_v8, %v4310_v9  ;;  %v11865_v8 = vld [vmem:[%s12046_s22 + $0xb4] sm:$0xff]  }
 0x104   : > { %10722 = vmatprep.mubr.msk.bf16.mxu1 %vm11990_vm1, %v11989_v1  ;;  %10726 = vmatprep.subr.bf16.mxu0 %v11989_v1 }
 0x105   : > { %10732 = vmatprep.subr.bf16.mxu1 %v11989_v1 }
 0x109   : > { %10717 = vmatmul.mubr.msk.bf16.vlgmr.msra.gmra.mrb[24].mxu0 %vm303_vm3, %v11833_v11  ;;  %v4431_v11 = vshll.u32 %v11851_v3, 16  ;;  %v4815_v3 = vshll.u32 %v11863_v58, 16 }
 0x10a   : > { %10723 = vmatmul.mubr.msk.bf16.vlgmr.msra.gmra.mrb[24].mxu1 %vm303_vm3, %v11834_v12  ;;  %10727 = vmatpush3.bf16.msra.mxu0 %v12406_v60  ;;  %v4247_v12 = vsel %vm290_vm2, %v4242_v4, %v4246_v5  ;;  %v4749_v5 = vshrl.u32 %v11861_v53, 16 }
 0x10b   : > { %10733 = vmatpush3.bf16.msra.mxu1 %v12406_v60  ;;  %10728 = vmatprep.mubr.msk.bf16.mxu0 %vm11990_vm1, %v11989_v1  ;;  %v11849_v60 = vld [vmem:[%s12046_s22 + $0x54] sm:$0xff]   ;;  %v4433_v19 = vrot.slane %v4431_v11, 1  ;;  %v4817_v11 = vrot.slane %v4815_v3, 1 }
 0x10c   : > { %10734 = vmatprep.mubr.msk.bf16.mxu1 %vm11990_vm1, %v11989_v1  ;;  %10738 = vmatprep.subr.bf16.mxu0 %v11989_v1  ;;  %v4367_v7 = vshll.u32 %v11849_v60, 16  ;;  %v4365_v13 = vshrl.u32 %v11849_v60, 16  ;;  %v11862_v60 = vld [vmem:[%s12046_s22 + $0xa4] ss:$0 sps:$4 sm:$0x11]  }
 0x10d   : > { %10744 = vmatprep.subr.bf16.mxu1 %v11989_v1  ;;  %v4434_v26 = vor.u32 %v4433_v19, %v4429_v18 }
 0x10e   : > { %v4369_v14 = vrot.slane %v4367_v7, 1  ;;  %v4756_v7 = vshll.u32 %v11862_v60, 16  ;;  %v11880_v60 = vld [vmem:[%s12046_s22 + $0x50] ss:$0 sps:$4 sm:$0x11]  }
 0x110   : > { %v4370_v2 = vor.u32 %v4369_v14, %v4365_v13  ;;  %v11867_v13 = vld [vmem:[%s12046_s22 + $0xc0] sm:$0xff]   ;;  %v4758_v15 = vrot.slane %v4756_v7, 1 }
 0x111   : > { %10729 = vmatmul.mubr.msk.bf16.vlgmr.msra.gmra.mrb[28].mxu0 %vm303_vm3, %v11835_v20  ;;  %v4436_v20 = vshll.u32 %v11852_v10, 16  ;;  %v4813_v10 = vshrl.u32 %v11863_v58, 16  ;;  %v11878_v58 = vld [vmem:[%s12046_s22 + $0x44] ss:$0 sps:$4 sm:$0x11]  }
 0x112   : > { %10735 = vmatmul.mubr.msk.bf16.vlgmr.msra.gmra.mrb[28].mxu1 %vm303_vm3, %v11836_v21  ;;  %10739 = vmatpush3.bf16.msra.mxu0 %v12513_v25  ;;  %v11855_v21 = vld [vmem:[%s12046_s22 + $0x78] sm:$0xff]   ;;  %v4375_v30 = vsel %vm290_vm2, %v4370_v2, %v4374_v22  ;;  %v4877_v22 = vshrl.u32 %v11865_v8, 16  ;;  %v11883_v7 = vld [vmem:[%s12046_s22 + $0x60] sm:$0xfe]  }
 0x113   : > { %10745 = vmatpush3.bf16.msra.mxu1 %v12513_v25  ;;  %10740 = vmatprep.mubr.msk.bf16.mxu0 %vm11990_vm1, %v11989_v1  ;;  %v4438_v27 = vrot.slane %v4436_v20, 1  ;;  %v4559_v29 = vshll.u32 %v11855_v21, 16  ;;  %v4557_v36 = vshrl.u32 %v11855_v21, 16  ;;  %v4818_v18 = vor.u32 %v4817_v11, %v4813_v10  ;;  %v11868_v20 = vld [vmem:[%s12046_s22 + $0xc8] ss:$0 sps:$4 sm:$0x11]  }
 0x114   : > { %10746 = vmatprep.mubr.msk.bf16.mxu1 %vm11990_vm1, %v11989_v1  ;;  %10750 = vmatprep.subr.bf16.mxu0 %v11989_v1  ;;  %v4943_v21 = vshll.u32 %v11867_v13, 16  ;;  %v5474_v11 = vrot.slane %v11883_v7, 1  ;;  %v11914_v7 = vld [vmem:[%s12046_s22 + $0xb4] sm:$0xff]  }
 0x115   : > { %10756 = vmatprep.subr.bf16.mxu1 %v11989_v1  ;;  %v4439_v35 = vsel %vm290_vm2, %v4434_v26, %v4438_v27  ;;  %v4561_v37 = vrot.slane %v4559_v29, 1  ;;  %v4941_v27 = vshrl.u32 %v11867_v13, 16  ;;  %v4948_v29 = vshll.u32 %v11868_v20, 16 }
 0x117   : > { %v4562_v45 = vor.u32 %v4561_v37, %v4557_v36  ;;  %v4950_v33 = vrot.slane %v4948_v29, 1  ;;  %v11869_v36 = vld [vmem:[%s12046_s22 + $0xc] sm:$0xfe]  }
 0x118   : > { %v5086_v42 = vrot.slane %v11869_v36, 1 }
 0x119   : > { %10741 = vmatmul.mubr.msk.bf16.vlgmr.msra.gmra.mrb[0].mxu0 %vm303_vm3, %v3988_v38  ;;  %v4564_v38 = vshll.u32 %v11856_v28, 16  ;;  %v4945_v28 = vrot.slane %v4943_v21, 1 }
 0x11a   : > { %10747 = vmatmul.mubr.msk.bf16.vlgmr.msra.gmra.mrb[0].mxu1 %vm303_vm3, %v4055_v44  ;;  %10751 = vmatpush3.bf16.msra.mxu0 %v12513_v25  ;;  %v4623_v44 = vshll.u32 %v11857_v34, 16  ;;  %v9594_v34 = vld [vmem:[%s13242_s1 + $0xa] sm:$0x3] }
 0x11b   : > { %10757 = vmatpush3.bf16.msra.mxu1 %v12513_v25  ;;  %10752 = vmatprep.mubr.msk.bf16.mxu0 %vm11990_vm1, %v11989_v1  ;;  %v4566_v46 = vrot.slane %v4564_v38, 1  ;;  %v4946_v32 = vor.u32 %v4945_v28, %v4941_v27  ;;  %v12644_v38 = vsel %vm307_vm0, %v9594_v34, 0  ;;  %v11891_v27 = vld [vmem:[%s12046_s22 + $0x90] sm:$0xfe]   ;;  %v11893_v34 = vld [vmem:[%s12046_s22 + $0x9c] sm:$0xfe]  }
 0x11c   : > { %10758 = vmatprep.mubr.msk.bf16.mxu1 %vm11990_vm1, %v11989_v1  ;;  %10762 = vmatprep.subr.bf16.mxu0 %v11989_v1  ;;  %v4625_v51 = vrot.slane %v4623_v44, 1  ;;  %v5144_v44 = vrot.slane %v11871_v40, 1  ;;  %v11892_v28 = vld [vmem:[%s12046_s22 + $0x98] ss:$0 sps:$4 sm:$0x11]   ;;  %v5749_v40 = vrot.slane %v11893_v34, 1 }
 0x11d   : > { %10768 = vmatprep.subr.bf16.mxu1 %v11989_v1  ;;  %v4567_v54 = vsel %vm290_vm2, %v4562_v45, %v4566_v46  ;;  %v4951_v37 = vsel %vm290_vm2, %v4946_v32, %v4950_v33  ;;  %v5145_v45 = vrot.slane %v11872_v41, 1  ;;  %v5695_v32 = vrot.slane %v11892_v28, 1  ;;  %v11922_v28 = vld [vmem:[%s12046_s22 + $0x38] ss:$0 sps:$4 sm:$0x11]  }
 0x11e   : > { %v4626_v39 = vor.u32 %v4625_v51, %v4621_v50  ;;  %v11875_v50 = vld [vmem:[%s12046_s22 + $0x30] sm:$0xfe]   ;;  %v11876_v51 = vld [vmem:[%s12046_s22 + $0x38] ss:$0 sps:$4 sm:$0x11]  }
 0x11f   : > { %v5255_v55 = vrot.slane %v11876_v51, 1 }
 0x120   : > { %v4631_v4 = vsel %vm290_vm2, %v4626_v39, %v4630_v59  ;;  %v11879_v59 = vld [vmem:[%s12046_s22 + $0x48] sm:$0xfe]  }
 0x121   : > { %10753 = vmatmul.mubr.msk.bf16.vlgmr.msra.gmra.mrb[4].mxu0 %vm303_vm3, %v4119_v57  ;;  %v4692_v57 = vshll.u32 %v11860_v47, 16  ;;  %v11873_v47 = vld [vmem:[%s12046_s22 + $0x24] sm:$0xfe]  }
 0x122   : > { %10759 = vmatmul.mubr.msk.bf16.vlgmr.msra.gmra.mrb[4].mxu1 %vm303_vm3, %v4183_v61  ;;  %10763 = vmatpush3.bf16.msra.mxu0 %v12513_v25  ;;  %v4751_v61 = vshll.u32 %v11861_v53, 16  ;;  %v5199_v52 = vrot.slane %v11873_v47, 1  ;;  %v5200_v53 = vrot.slane %v11874_v48, 1  ;;  %v11899_v48 = vld [vmem:[%s12046_s22 + $0xc0] sm:$0xfe]  }
 0x123   : > { %10769 = vmatpush3.bf16.msra.mxu1 %v12513_v25  ;;  %10764 = vmatprep.mubr.msk.bf16.mxu0 %vm11990_vm1, %v11989_v1  ;;  %v4694_v63 = vrot.slane %v4692_v57, 1  ;;  %v11877_v57 = vld [vmem:[%s12046_s22 + $0x3c] sm:$0xfe]  }
 0x124   : > { %10770 = vmatprep.mubr.msk.bf16.mxu1 %vm11990_vm1, %v11989_v1  ;;  %10774 = vmatprep.subr.bf16.mxu0 %v11989_v1  ;;  %v4753_v6 = vrot.slane %v4751_v61, 1  ;;  %v5201_v56 = vsel %vm2157_vm4, %v5199_v52, %v5200_v53  ;;  %v5309_v61 = vrot.slane %v11877_v57, 1  ;;  %v5914_v52 = vrot.slane %v11899_v48, 1  ;;  %v11901_v57 = vld [vmem:[%s12046_s22 + $0x18] sm:$0xff]  }
 0x125   : > { %10780 = vmatprep.subr.bf16.mxu1 %v11989_v1  ;;  %v4695_v9 = vsel %vm290_vm2, %v4690_v62, %v4694_v63  ;;  %v5310_v62 = vrot.slane %v11878_v58, 1  ;;  %v5364_v63 = vrot.slane %v11879_v59, 1  ;;  %v11902_v58 = vld [vmem:[%s12046_s22 + $0x24] sm:$0xff]   ;;  %v11904_v59 = vld [vmem:[%s12046_s22 + $0x3c] sm:$0xff]  }
 0x126   : > { %v4754_v14 = vor.u32 %v4753_v6, %v4749_v5  ;;  %v11882_v5 = vld [vmem:[%s12046_s22 + $0x5c] ss:$0 sps:$4 sm:$0x11]  }
 0x127   : > { %v5311_v3 = vsel %vm2157_vm4, %v5309_v61, %v5310_v62  ;;  %v5420_v10 = vrot.slane %v11882_v5, 1  ;;  %v11906_v61 = vld [vmem:[%s12046_s22 + $0x54] sm:$0xff]   ;;  %v11907_v62 = vld [vmem:[%s12046_s22 + $0x60] sm:$0xff]  }
 0x128   : > { %v4759_v2 = vsel %vm290_vm2, %v4754_v14, %v4758_v15  ;;  %v11885_v14 = vld [vmem:[%s12046_s22 + $0x6c] sm:$0xfe]   ;;  %v11886_v15 = vld [vmem:[%s12046_s22 + $0x74] ss:$0 sps:$4 sm:$0x11]   ;;  %v11912_v5 = vld [vmem:[%s12046_s22 + $0x9c] sm:$0xff]  }
 0x129   : > { %10765 = vmatmul.mubr.msk.bf16.vlgmr.msra.gmra.mrb[8].mxu0 %vm303_vm3, %v4247_v12  ;;  %v4820_v12 = vshll.u32 %v11864_v0, 16  ;;  %v5365_v0 = vrot.slane %v11880_v60, 1  ;;  %v5530_v20 = vrot.slane %v11886_v15, 1  ;;  %v11905_v60 = vld [vmem:[%s12046_s22 + $0x48] sm:$0xff]   ;;  %v11915_v15 = vld [vmem:[%s12046_s22 + $0xc0] sm:$0xff]  }
 0x12a   : > { %10771 = vmatmul.mubr.msk.bf16.vlgmr.msra.gmra.mrb[8].mxu1 %vm303_vm3, %v4311_v17  ;;  %10775 = vmatpush3.bf16.msra.mxu0 %v12513_v25  ;;  %v4879_v17 = vshll.u32 %v11865_v8, 16  ;;  %v11884_v8 = vld [vmem:[%s12046_s22 + $0x68] ss:$0 sps:$4 sm:$0x11]  }
 0x12b   : > { %10781 = vmatpush3.bf16.msra.mxu1 %v12513_v25  ;;  %10776 = vmatprep.mubr.msk.bf16.mxu0 %vm11990_vm1, %v11989_v1  ;;  %v4822_v19 = vrot.slane %v4820_v12, 1  ;;  %v5366_v6 = vsel %vm2157_vm4, %v5364_v63, %v5365_v0  ;;  %v5475_v12 = vrot.slane %v11884_v8, 1  ;;  %v11908_v63 = vld [vmem:[%s12046_s22 + $0x6c] sm:$0xff]   ;;  %v11909_v0 = vld [vmem:[%s12046_s22 + $0x78] sm:$0xff]  }
 0x12c   : > { %10782 = vmatprep.mubr.msk.bf16.mxu1 %vm11990_vm1, %v11989_v1  ;;  %10786 = vmatprep.subr.bf16.mxu0 %v11989_v1  ;;  %v4881_v23 = vrot.slane %v4879_v17, 1  ;;  %v11887_v17 = vld [vmem:[%s12046_s22 + $0x78] sm:$0xfe]  }
 0x12d   : > { %10792 = vmatprep.subr.bf16.mxu1 %v11989_v1  ;;  %v4823_v26 = vsel %vm290_vm2, %v4818_v18, %v4822_v19  ;;  %v5476_v16 = vsel %vm2157_vm4, %v5474_v11, %v5475_v12  ;;  %v11888_v18 = vld [vmem:[%s12046_s22 + $0x80] ss:$0 sps:$4 sm:$0x11]   ;;  %v5529_v19 = vrot.slane %v11885_v14, 1  ;;  %v5584_v21 = vrot.slane %v11887_v17, 1  ;;  %v11917_v8 = vld [vmem:[%s12046_s22 + $0x18] sm:$0xff]  }
 0x12e   : > { %v6908_v11 = vshll.u32 %v11917_v8, 16  ;;  %v11920_v12 = vld [vmem:[%s12046_s22 + $0x2c] ss:$0 sps:$4 sm:$0x11]   ;;  %v9756_v14 = vld [vmem:[%s13242_s1 + $0xe] sm:$0x3] }
 0x12f   : > { %v6906_v17 = vshrl.u32 %v11917_v8, 16 }
 0x131   : > { %10777 = vmatmul.mubr.msk.bf16.vlgmr.msra.gmra.mrb[12].mxu0 %vm303_vm3, %v4375_v30  ;;  %v4882_v30 = vor.u32 %v4881_v23, %v4877_v22  ;;  %v5531_v22 = vsel %vm2157_vm4, %v5529_v19, %v5530_v20  ;;  %v11889_v23 = vld [vmem:[%s12046_s22 + $0x84] sm:$0xfe]   ;;  %v11921_v20 = vld [vmem:[%s12046_s22 + $0x30] sm:$0xff]  }
 0x132   : > { %10783 = vmatmul.mubr.msk.bf16.vlgmr.msra.gmra.mrb[12].mxu1 %vm303_vm3, %v4439_v35  ;;  %10787 = vmatpush3.bf16.msra.mxu0 %v12513_v25  ;;  %v5639_v29 = vrot.slane %v11889_v23, 1  ;;  %v6980_v23 = vshll.u32 %v11920_v12, 16 }
 0x133   : > { %10793 = vmatpush3.bf16.msra.mxu1 %v12513_v25  ;;  %10788 = vmatprep.mubr.msk.bf16.mxu0 %vm11990_vm1, %v11989_v1  ;;  %v4887_v35 = vsel %vm290_vm2, %v4882_v30, %v4886_v31  ;;  %v5640_v30 = vrot.slane %v11890_v24, 1  ;;  %v5694_v31 = vrot.slane %v11891_v27, 1  ;;  %v11923_v24 = vld [vmem:[%s12046_s22 + $0x3c] sm:$0xff]  }
 0x134   : > { %10794 = vmatprep.mubr.msk.bf16.mxu1 %vm11990_vm1, %v11989_v1  ;;  %10798 = vmatprep.subr.bf16.mxu0 %v11989_v1 }
 0x135   : > { %10804 = vmatprep.subr.bf16.mxu1 %v11989_v1  ;;  %v5641_v33 = vsel %vm2157_vm4, %v5639_v29, %v5640_v30  ;;  %v5696_v36 = vsel %vm2157_vm4, %v5694_v31, %v5695_v32  ;;  %v7039_v29 = vshll.u32 %v11921_v20, 16  ;;  %v6982_v31 = vrot.slane %v6980_v23, 1  ;;  %v11924_v32 = vld [vmem:[%s12046_s22 + $0x44] ss:$0 sps:$4 sm:$0x11]  }
 0x136   : > { %v11936_v23 = vld [vmem:[%s12046_s22 + $0x8c] ss:$0 sps:$4 sm:$0x11]  }
 0x139   : > { %10789 = vmatmul.mubr.msk.bf16.vlgmr.msra.gmra.mrb[16].mxu0 %vm303_vm3, %v4503_v49  ;;  %v5146_v49 = vsel %vm2157_vm4, %v5144_v44, %v5145_v45  ;;  %v11897_v45 = vld [vmem:[%s12046_s22 + $0xb4] sm:$0xfe]  }
 0x13a   : > { %10795 = vmatmul.mubr.msk.bf16.vlgmr.msra.gmra.mrb[16].mxu1 %vm303_vm3, %v4567_v54  ;;  %10799 = vmatpush3.bf16.msra.mxu0 %v12513_v25  ;;  %v5254_v54 = vrot.slane %v11875_v50, 1  ;;  %v5859_v50 = vrot.slane %v11897_v45, 1 }
 0x13b   : > { %10805 = vmatpush3.bf16.msra.mxu1 %v12513_v25  ;;  %10800 = vmatprep.mubr.msk.bf16.mxu0 %vm11990_vm1, %v11989_v1 }
 0x13c   : > { %10806 = vmatprep.mubr.msk.bf16.mxu1 %vm11990_vm1, %v11989_v1  ;;  %10810 = vmatprep.subr.bf16.mxu0 %v11989_v1  ;;  %v5256_v39 = vsel %vm2157_vm4, %v5254_v54, %v5255_v55  ;;  %v9675_v54 = vld [vmem:[%s13242_s1 + $0xc] sm:$0x3] }
 0x13d   : > { %10816 = vmatprep.subr.bf16.mxu1 %v11989_v1 }
 0x141   : > { %10801 = vmatmul.mubr.msk.bf16.vlgmr.msra.gmra.mrb[20].mxu0 %vm303_vm3, %v4631_v4  ;;  %v11881_v4 = vld [vmem:[%s12046_s22 + $0x54] sm:$0xfe]  }
 0x142   : > { %10807 = vmatmul.mubr.msk.bf16.vlgmr.msra.gmra.mrb[20].mxu1 %vm303_vm3, %v4695_v9  ;;  %10811 = vmatpush3.bf16.msra.mxu0 %v12513_v25  ;;  %v5419_v9 = vrot.slane %v11881_v4, 1  ;;  %v11911_v4 = vld [vmem:[%s12046_s22 + $0x90] sm:$0xff]  }
 0x143   : > { %10817 = vmatpush3.bf16.msra.mxu1 %v12513_v25  ;;  %10812 = vmatprep.mubr.msk.bf16.mxu0 %vm11990_vm1, %v11989_v1 }
 0x144   : > { %10818 = vmatprep.mubr.msk.bf16.mxu1 %vm11990_vm1, %v11989_v1  ;;  %10822 = vmatprep.subr.bf16.mxu0 %v11989_v1  ;;  %v5421_v13 = vsel %vm2157_vm4, %v5419_v9, %v5420_v10  ;;  %v11919_v9 = vld [vmem:[%s12046_s22 + $0x24] sm:$0xff]   ;;  %v11918_v10 = vld [vmem:[%s12046_s22 + $0x20] ss:$0 sps:$4 sm:$0x11]  }
 0x145   : > { %10828 = vmatprep.subr.bf16.mxu1 %v11989_v1  ;;  %v6913_v19 = vshll.u32 %v11918_v10, 16 }
 0x147   : > { %v6915_v27 = vrot.slane %v6913_v19, 1  ;;  %v11934_v19 = vld [vmem:[%s12046_s22 + $0x80] ss:$0 sps:$4 sm:$0x11]  }
 0x149   : > { %10813 = vmatmul.mubr.msk.bf16.vlgmr.msra.gmra.mrb[24].mxu0 %vm303_vm3, %v4759_v2  ;;  %v5585_v2 = vrot.slane %v11888_v18, 1  ;;  %v6910_v18 = vrot.slane %v6908_v11, 1  ;;  %v11933_v11 = vld [vmem:[%s12046_s22 + $0x78] sm:$0xff]  }
 0x14a   : > { %10819 = vmatmul.mubr.msk.bf16.vlgmr.msra.gmra.mrb[24].mxu1 %vm303_vm3, %v4823_v26  ;;  %10823 = vmatpush3.bf16.msra.mxu0 %v12513_v25 }
 0x14b   : > { %10829 = vmatpush3.bf16.msra.mxu1 %v12513_v25  ;;  %10824 = vmatprep.mubr.msk.bf16.mxu0 %vm11990_vm1, %v11989_v1  ;;  %v11870_v25 = vld [vmem:[%s12046_s22 + $0x14] ss:$0 sps:$4 sm:$0x11]   ;;  %v5586_v26 = vsel %vm2157_vm4, %v5584_v21, %v5585_v2  ;;  %v12883_v21 = vsel %vm307_vm0, %v9756_v14, 0  ;;  %v6973_v2 = vshrl.u32 %v11919_v9, 16 }
 0x14c   : > { %10830 = vmatprep.mubr.msk.bf16.mxu1 %vm11990_vm1, %v11989_v1  ;;  %10834 = vmatprep.subr.bf16.mxu0 %v11989_v1  ;;  %v5087_v43 = vrot.slane %v11870_v25, 1  ;;  %v11895_v25 = vld [vmem:[%s12046_s22 + $0xa8] sm:$0xfe]  }
 0x14d   : > { %10840 = vmatprep.subr.bf16.mxu1 %v11989_v1 }
 0x14e   : > { %v5088_v46 = vsel %vm2157_vm4, %v5086_v42, %v5087_v43  ;;  %v5804_v42 = vrot.slane %v11895_v25, 1  ;;  %v7044_v25 = vshll.u32 %v11922_v28, 16 }
 0x151   : > { %10825 = vmatmul.mubr.msk.bf16.vlgmr.msra.gmra.mrb[28].mxu0 %vm303_vm3, %v4887_v35  ;;  %v11894_v35 = vld [vmem:[%s12046_s22 + $0xa4] ss:$0 sps:$4 sm:$0x11]  }
 0x152   : > { %10831 = vmatmul.mubr.msk.bf16.vlgmr.msra.gmra.mrb[28].mxu1 %vm303_vm3, %v4951_v37  ;;  %10835 = vmatpush3.bf16.msra.mxu0 %v12644_v38  ;;  %v11896_v37 = vld [vmem:[%s12046_s22 + $0xb0] ss:$0 sps:$4 sm:$0x11]   ;;  %v5750_v41 = vrot.slane %v11894_v35, 1  ;;  %v7037_v35 = vshrl.u32 %v11921_v20, 16  ;;  %v7423_v20 = vshll.u32 %v11933_v11, 16 }
 0x153   : > { %10841 = vmatpush3.bf16.msra.mxu1 %v12644_v38  ;;  %10836 = vmatprep.mubr.msk.bf16.mxu0 %vm11990_vm1, %v11989_v1  ;;  %v5805_v43 = vrot.slane %v11896_v37, 1  ;;  %v11925_v37 = vld [vmem:[%s12046_s22 + $0x48] sm:$0xff]  }
 0x154   : > { %10842 = vmatprep.mubr.msk.bf16.mxu1 %vm11990_vm1, %v11989_v1  ;;  %10846 = vmatprep.subr.bf16.mxu0 %v11989_v1  ;;  %v5751_v44 = vsel %vm2157_vm4, %v5749_v40, %v5750_v41  ;;  %v7101_v41 = vshrl.u32 %v11923_v24, 16  ;;  %v7167_v48 = vshll.u32 %v11925_v37, 16  ;;  %v7425_v28 = vrot.slane %v7423_v20, 1 }
 0x155   : > { %10852 = vmatprep.subr.bf16.mxu1 %v11989_v1  ;;  %v5806_v47 = vsel %vm2157_vm4, %v5804_v42, %v5805_v43  ;;  %v7108_v43 = vshll.u32 %v11924_v32, 16 }
 0x159   : > { %10837 = vmatmul.mubr.msk.bf16.vlgmr.msra.gmra.mrb[0].mxu0 %vm303_vm3, %v5088_v46  ;;  %v11898_v46 = vld [vmem:[%s12046_s22 + $0xbc] ss:$0 sps:$4 sm:$0x11]  }
 0x15a   : > { %10843 = vmatmul.mubr.msk.bf16.vlgmr.msra.gmra.mrb[0].mxu1 %vm303_vm3, %v5146_v49  ;;  %10847 = vmatpush3.bf16.msra.mxu0 %v12644_v38  ;;  %v11900_v49 = vld [vmem:[%s12046_s22 + $0xc8] ss:$0 sps:$4 sm:$0x11]   ;;  %v5860_v51 = vrot.slane %v11898_v46, 1  ;;  %v7046_v46 = vrot.slane %v7044_v25, 1 }
 0x15b   : > { %10853 = vmatpush3.bf16.msra.mxu1 %v12644_v38  ;;  %10848 = vmatprep.mubr.msk.bf16.mxu0 %vm11990_vm1, %v11989_v1  ;;  %v5915_v53 = vrot.slane %v11900_v49, 1 }
 0x15c   : > { %10854 = vmatprep.mubr.msk.bf16.mxu1 %vm11990_vm1, %v11989_v1  ;;  %10858 = vmatprep.subr.bf16.mxu0 %v11989_v1 }
 0x15d   : > { %10864 = vmatprep.subr.bf16.mxu1 %v11989_v1  ;;  %v5916_v55 = vsel %vm2157_vm4, %v5914_v52, %v5915_v53 }
 0x161   : > { %10849 = vmatmul.mubr.msk.bf16.vlgmr.msra.gmra.mrb[4].mxu0 %vm303_vm3, %v5201_v56  ;;  %v12776_v56 = vsel %vm307_vm0, %v9675_v54, 0  ;;  %v7165_v54 = vshrl.u32 %v11925_v37, 16  ;;  %v11938_v37 = vld [vmem:[%s12046_s22 + $0x98] ss:$0 sps:$4 sm:$0x11]  }
 0x162   : > { %10855 = vmatmul.mubr.msk.bf16.vlgmr.msra.gmra.mrb[4].mxu1 %vm303_vm3, %v5256_v39  ;;  %10859 = vmatpush3.bf16.msra.mxu0 %v12644_v38  ;;  %v11903_v39 = vld [vmem:[%s12046_s22 + $0x30] sm:$0xff]  }
 0x163   : > { %10865 = vmatpush3.bf16.msra.mxu1 %v12644_v38  ;;  %10860 = vmatprep.mubr.msk.bf16.mxu0 %vm11990_vm1, %v11989_v1 }
 0x164   : > { %10866 = vmatprep.mubr.msk.bf16.mxu1 %vm11990_vm1, %v11989_v1  ;;  %10870 = vmatprep.subr.bf16.mxu0 %v11989_v1 }
 0x165   : > { %10876 = vmatprep.subr.bf16.mxu1 %v11989_v1 }
 0x169   : > { %10861 = vmatmul.mubr.msk.bf16.vlgmr.msra.gmra.mrb[8].mxu0 %vm303_vm3, %v5311_v3  ;;  %v11910_v3 = vld [vmem:[%s12046_s22 + $0x84] sm:$0xff]  }
 0x16a   : > { %10867 = vmatmul.mubr.msk.bf16.vlgmr.msra.gmra.mrb[8].mxu1 %vm303_vm3, %v5366_v6  ;;  %10871 = vmatpush3.bf16.msra.mxu0 %v12644_v38  ;;  %v11913_v6 = vld [vmem:[%s12046_s22 + $0xa8] sm:$0xff]  }
 0x16b   : > { %10877 = vmatpush3.bf16.msra.mxu1 %v12644_v38  ;;  %10872 = vmatprep.mubr.msk.bf16.mxu0 %vm11990_vm1, %v11989_v1 }
 0x16c   : > { %10878 = vmatprep.mubr.msk.bf16.mxu1 %vm11990_vm1, %v11989_v1  ;;  %10882 = vmatprep.subr.bf16.mxu0 %v11989_v1 }
 0x16d   : > { %10888 = vmatprep.subr.bf16.mxu1 %v11989_v1 }
 0x171   : > { %10873 = vmatmul.mubr.msk.bf16.vlgmr.msra.gmra.mrb[12].mxu0 %vm303_vm3, %v5421_v13  ;;  %v6975_v13 = vshll.u32 %v11919_v9, 16 }
 0x172   : > { %10879 = vmatmul.mubr.msk.bf16.vlgmr.msra.gmra.mrb[12].mxu1 %vm303_vm3, %v5476_v16  ;;  %10883 = vmatpush3.bf16.msra.mxu0 %v12644_v38  ;;  %v11916_v16 = vld [vmem:[%s12046_s22 + $0xcc] sm:$0xff]  }
 0x173   : > { %10889 = vmatpush3.bf16.msra.mxu1 %v12644_v38  ;;  %10884 = vmatprep.mubr.msk.bf16.mxu0 %vm11990_vm1, %v11989_v1 }
 0x174   : > { %10890 = vmatprep.mubr.msk.bf16.mxu1 %vm11990_vm1, %v11989_v1  ;;  %10894 = vmatprep.subr.bf16.mxu0 %v11989_v1 }
 0x175   : > { %10900 = vmatprep.subr.bf16.mxu1 %v11989_v1 }
 0x179   : > { %10885 = vmatmul.mubr.msk.bf16.vlgmr.msra.gmra.mrb[16].mxu0 %vm303_vm3, %v5531_v22  ;;  %v6977_v22 = vrot.slane %v6975_v13, 1 }
 0x17a   : > { %10891 = vmatmul.mubr.msk.bf16.vlgmr.msra.gmra.mrb[16].mxu1 %vm303_vm3, %v5586_v26  ;;  %10895 = vmatpush3.bf16.msra.mxu0 %v12644_v38  ;;  %v6911_v26 = vor.u32 %v6910_v18, %v6906_v17 }
 0x17b   : > { %10901 = vmatpush3.bf16.msra.mxu1 %v12644_v38  ;;  %10896 = vmatprep.mubr.msk.bf16.mxu0 %vm11990_vm1, %v11989_v1  ;;  %v6978_v30 = vor.u32 %v6977_v22, %v6973_v2 }
 0x17c   : > { %10902 = vmatprep.mubr.msk.bf16.mxu1 %vm11990_vm1, %v11989_v1  ;;  %10906 = vmatprep.subr.bf16.mxu0 %v11989_v1  ;;  %v6916_v34 = vsel %vm290_vm2, %v6911_v26, %v6915_v27  ;;  %v7421_v27 = vshrl.u32 %v11933_v11, 16  ;;  %v11946_v11 = vld [vmem:[%s12046_s22 + $0xc8] ss:$0 sps:$4 sm:$0x11]  }
 0x17d   : > { %10912 = vmatprep.subr.bf16.mxu1 %v11989_v1  ;;  %v6983_v40 = vsel %vm290_vm2, %v6978_v30, %v6982_v31  ;;  %v11937_v30 = vld [vmem:[%s12046_s22 + $0x90] sm:$0xff]   ;;  %v7812_v20 = vshll.u32 %v11946_v11, 16 }
 0x181   : > { %10897 = vmatmul.mubr.msk.bf16.vlgmr.msra.gmra.mrb[20].mxu0 %vm303_vm3, %v5641_v33  ;;  %v7103_v33 = vshll.u32 %v11923_v24, 16 }
 0x182   : > { %10903 = vmatmul.mubr.msk.bf16.vlgmr.msra.gmra.mrb[20].mxu1 %vm303_vm3, %v5696_v36  ;;  %10907 = vmatpush3.bf16.msra.mxu0 %v12644_v38  ;;  %v7041_v36 = vrot.slane %v7039_v29, 1  ;;  %v7428_v29 = vshll.u32 %v11934_v19, 16 }
 0x183   : > { %10913 = vmatpush3.bf16.msra.mxu1 %v12644_v38  ;;  %10908 = vmatprep.mubr.msk.bf16.mxu0 %vm11990_vm1, %v11989_v1  ;;  %v7105_v42 = vrot.slane %v7103_v33, 1 }
 0x184   : > { %10914 = vmatprep.mubr.msk.bf16.mxu1 %vm11990_vm1, %v11989_v1  ;;  %10918 = vmatprep.subr.bf16.mxu0 %v11989_v1  ;;  %v7042_v45 = vor.u32 %v7041_v36, %v7037_v35  ;;  %v11939_v35 = vld [vmem:[%s12046_s22 + $0x9c] sm:$0xff]   ;;  %v7426_v36 = vor.u32 %v7425_v28, %v7421_v27  ;;  %v7430_v25 = vrot.slane %v7428_v29, 1  ;;  %v7814_v27 = vrot.slane %v7812_v20, 1  ;;  %v11970_v20 = vld [vmem:[%s12046_s22 + $0x98] ss:$0 sps:$4 sm:$0x11]  }
 0x185   : > { %10924 = vmatprep.subr.bf16.mxu1 %v11989_v1  ;;  %v7106_v49 = vor.u32 %v7105_v42, %v7101_v41 }
 0x186   : > { %v7047_v53 = vsel %vm290_vm2, %v7042_v45, %v7046_v46  ;;  %v7431_v45 = vsel %vm290_vm2, %v7426_v36, %v7430_v25  ;;  %v7549_v46 = vshrl.u32 %v11937_v30, 16  ;;  %v11952_v36 = vld [vmem:[%s12046_s22 + $0x2c] ss:$0 sps:$4 sm:$0x11]  }
 0x189   : > { %10909 = vmatmul.mubr.msk.bf16.vlgmr.msra.gmra.mrb[24].mxu0 %vm303_vm3, %v5751_v44  ;;  %v11927_v44 = vld [vmem:[%s12046_s22 + $0x54] sm:$0xff]  }
 0x18a   : > { %10915 = vmatmul.mubr.msk.bf16.vlgmr.msra.gmra.mrb[24].mxu1 %vm303_vm3, %v5806_v47  ;;  %10919 = vmatpush3.bf16.msra.mxu0 %v12644_v38  ;;  %v11926_v47 = vld [vmem:[%s12046_s22 + $0x50] ss:$0 sps:$4 sm:$0x11]   ;;  %v7231_v52 = vshll.u32 %v11927_v44, 16 }
 0x18b   : > { %10925 = vmatpush3.bf16.msra.mxu1 %v12644_v38  ;;  %10920 = vmatprep.mubr.msk.bf16.mxu0 %vm11990_vm1, %v11989_v1  ;;  %v5861_v38 = vsel %vm2157_vm4, %v5859_v50, %v5860_v51  ;;  %v7110_v50 = vrot.slane %v7108_v43, 1  ;;  %v11928_v51 = vld [vmem:[%s12046_s22 + $0x5c] ss:$0 sps:$4 sm:$0x11]  }
 0x18c   : > { %10926 = vmatprep.mubr.msk.bf16.mxu1 %vm11990_vm1, %v11989_v1  ;;  %10930 = vmatprep.subr.bf16.mxu0 %v11989_v1  ;;  %v11940_v43 = vld [vmem:[%s12046_s22 + $0xa4] ss:$0 sps:$4 sm:$0x11]  }
 0x18d   : > { %10936 = vmatprep.subr.bf16.mxu1 %v11989_v1 }
 0x191   : > { %10921 = vmatmul.mubr.msk.bf16.vlgmr.msra.gmra.mrb[28].mxu0 %vm303_vm3, %v5861_v38  ;;  %v7169_v38 = vrot.slane %v7167_v48, 1  ;;  %v7556_v48 = vshll.u32 %v11938_v37, 16 }
 0x192   : > { %10927 = vmatmul.mubr.msk.bf16.vlgmr.msra.gmra.mrb[28].mxu1 %vm303_vm3, %v5916_v55  ;;  %10931 = vmatpush3.bf16.msra.mxu0 %v12776_v56  ;;  %v7172_v55 = vshll.u32 %v11926_v47, 16 }
 0x193   : > { %10937 = vmatpush3.bf16.msra.mxu1 %v12776_v56  ;;  %10932 = vmatprep.mubr.msk.bf16.mxu0 %vm11990_vm1, %v11989_v1 }
 0x194   : > { %10938 = vmatprep.mubr.msk.bf16.mxu1 %vm11990_vm1, %v11989_v1  ;;  %10942 = vmatprep.subr.bf16.mxu0 %v11989_v1 }
 0x195   : > { %10948 = vmatprep.subr.bf16.mxu1 %v11989_v1 }
 0x199   : > { %10933 = vmatmul.mubr.msk.bf16.vlgmr.msra.gmra.mrb[0].mxu0 %vm303_vm3, %v11901_v57  ;;  %v7111_v57 = vsel %vm290_vm2, %v7106_v49, %v7110_v50  ;;  %v11941_v49 = vld [vmem:[%s12046_s22 + $0xa8] sm:$0xff]  }
 0x19a   : > { %10939 = vmatmul.mubr.msk.bf16.vlgmr.msra.gmra.mrb[0].mxu1 %vm303_vm3, %v11902_v58  ;;  %10943 = vmatpush3.bf16.msra.mxu0 %v12776_v56  ;;  %v7229_v58 = vshrl.u32 %v11927_v44, 16  ;;  %v7615_v44 = vshll.u32 %v11939_v35, 16 }
 0x19b   : > { %10949 = vmatpush3.bf16.msra.mxu1 %v12776_v56  ;;  %10944 = vmatprep.mubr.msk.bf16.mxu0 %vm11990_vm1, %v11989_v1 }
 0x19c   : > { %10950 = vmatprep.mubr.msk.bf16.mxu1 %vm11990_vm1, %v11989_v1  ;;  %10954 = vmatprep.subr.bf16.mxu0 %v11989_v1 }
 0x19d   : > { %10960 = vmatprep.subr.bf16.mxu1 %v11989_v1 }
 0x1a1   : > { %10945 = vmatmul.mubr.msk.bf16.vlgmr.msra.gmra.mrb[4].mxu0 %vm303_vm3, %v11903_v39  ;;  %v7233_v39 = vrot.slane %v7231_v52, 1  ;;  %v7617_v52 = vrot.slane %v7615_v44, 1  ;;  %v11954_v44 = vld [vmem:[%s12046_s22 + $0x38] ss:$0 sps:$4 sm:$0x11]  }
 0x1a2   : > { %10951 = vmatmul.mubr.msk.bf16.vlgmr.msra.gmra.mrb[4].mxu1 %vm303_vm3, %v11904_v59  ;;  %10955 = vmatpush3.bf16.msra.mxu0 %v12776_v56  ;;  %v7236_v59 = vshll.u32 %v11928_v51, 16  ;;  %v7613_v51 = vshrl.u32 %v11939_v35, 16  ;;  %v11951_v35 = vld [vmem:[%s12046_s22 + $0x24] sm:$0xfe]  }
 0x1a3   : > { %10961 = vmatpush3.bf16.msra.mxu1 %v12776_v56  ;;  %10956 = vmatprep.mubr.msk.bf16.mxu0 %vm11990_vm1, %v11989_v1 }
 0x1a4   : > { %10962 = vmatprep.mubr.msk.bf16.mxu1 %vm11990_vm1, %v11989_v1  ;;  %10966 = vmatprep.subr.bf16.mxu0 %v11989_v1 }
 0x1a5   : > { %10972 = vmatprep.subr.bf16.mxu1 %v11989_v1 }
 0x1a9   : > { %10957 = vmatmul.mubr.msk.bf16.vlgmr.msra.gmra.mrb[8].mxu0 %vm303_vm3, %v11905_v60  ;;  %v11931_v60 = vld [vmem:[%s12046_s22 + $0x6c] sm:$0xff]  }
 0x1aa   : > { %10963 = vmatmul.mubr.msk.bf16.vlgmr.msra.gmra.mrb[8].mxu1 %vm303_vm3, %v11906_v61  ;;  %10967 = vmatpush3.bf16.msra.mxu0 %v12776_v56  ;;  %v7170_v61 = vor.u32 %v7169_v38, %v7165_v54  ;;  %v7357_v13 = vshrl.u32 %v11931_v60, 16  ;;  %v11943_v54 = vld [vmem:[%s12046_s22 + $0xb4] sm:$0xff]  }
 0x1ab   : > { %10973 = vmatpush3.bf16.msra.mxu1 %v12776_v56  ;;  %10968 = vmatprep.mubr.msk.bf16.mxu0 %vm11990_vm1, %v11989_v1 }
 0x1ac   : > { %10974 = vmatprep.mubr.msk.bf16.mxu1 %vm11990_vm1, %v11989_v1  ;;  %10978 = vmatprep.subr.bf16.mxu0 %v11989_v1 }
 0x1ad   : > { %10984 = vmatprep.subr.bf16.mxu1 %v11989_v1 }
 0x1b1   : > { %10969 = vmatmul.mubr.msk.bf16.vlgmr.msra.gmra.mrb[12].mxu0 %vm303_vm3, %v11907_v62  ;;  %v7174_v62 = vrot.slane %v7172_v55, 1  ;;  %v7558_v55 = vrot.slane %v7556_v48, 1 }
 0x1b2   : > { %10975 = vmatmul.mubr.msk.bf16.vlgmr.msra.gmra.mrb[12].mxu1 %vm303_vm3, %v11908_v63  ;;  %10979 = vmatpush3.bf16.msra.mxu0 %v12776_v56  ;;  %v11930_v63 = vld [vmem:[%s12046_s22 + $0x68] ss:$0 sps:$4 sm:$0x11]  }
 0x1b3   : > { %10985 = vmatpush3.bf16.msra.mxu1 %v12776_v56  ;;  %10980 = vmatprep.mubr.msk.bf16.mxu0 %vm11990_vm1, %v11989_v1  ;;  %v7300_v10 = vshll.u32 %v11930_v63, 16 }
 0x1b4   : > { %10986 = vmatprep.mubr.msk.bf16.mxu1 %vm11990_vm1, %v11989_v1  ;;  %10990 = vmatprep.subr.bf16.mxu0 %v11989_v1 }
 0x1b5   : > { %10996 = vmatprep.subr.bf16.mxu1 %v11989_v1  ;;  %v7302_v18 = vrot.slane %v7300_v10, 1 }
 0x1b9   : > { %10981 = vmatmul.mubr.msk.bf16.vlgmr.msra.gmra.mrb[16].mxu0 %vm303_vm3, %v11909_v0 }
 0x1ba   : > { %10987 = vmatmul.mubr.msk.bf16.vlgmr.msra.gmra.mrb[16].mxu1 %vm303_vm3, %v11910_v3  ;;  %10991 = vmatpush3.bf16.msra.mxu0 %v12776_v56  ;;  %v7234_v3 = vor.u32 %v7233_v39, %v7229_v58  ;;  %v7618_v58 = vor.u32 %v7617_v52, %v7613_v51 }
 0x1bb   : > { %10997 = vmatpush3.bf16.msra.mxu1 %v12776_v56  ;;  %10992 = vmatprep.mubr.msk.bf16.mxu0 %vm11990_vm1, %v11989_v1 }
 0x1bc   : > { %10998 = vmatprep.mubr.msk.bf16.mxu1 %vm11990_vm1, %v11989_v1  ;;  %11002 = vmatprep.subr.bf16.mxu0 %v11989_v1 }
 0x1bd   : > { %11008 = vmatprep.subr.bf16.mxu1 %v11989_v1 }
 0x1c1   : > { %10993 = vmatmul.mubr.msk.bf16.vlgmr.msra.gmra.mrb[20].mxu0 %vm303_vm3, %v11911_v4  ;;  %v7238_v4 = vrot.slane %v7236_v59, 1  ;;  %v11944_v59 = vld [vmem:[%s12046_s22 + $0xbc] ss:$0 sps:$4 sm:$0x11]  }
 0x1c2   : > { %10999 = vmatmul.mubr.msk.bf16.vlgmr.msra.gmra.mrb[20].mxu1 %vm303_vm3, %v11912_v5  ;;  %11003 = vmatpush3.bf16.msra.mxu0 %v12776_v56  ;;  %v11932_v5 = vld [vmem:[%s12046_s22 + $0x74] ss:$0 sps:$4 sm:$0x11]  }
 0x1c3   : > { %11009 = vmatpush3.bf16.msra.mxu1 %v12776_v56  ;;  %11004 = vmatprep.mubr.msk.bf16.mxu0 %vm11990_vm1, %v11989_v1  ;;  %v7239_v12 = vsel %vm290_vm2, %v7234_v3, %v7238_v4  ;;  %v11945_v3 = vld [vmem:[%s12046_s22 + $0xc0] sm:$0xff]  }
 0x1c4   : > { %11010 = vmatprep.mubr.msk.bf16.mxu1 %vm11990_vm1, %v11989_v1  ;;  %11014 = vmatprep.subr.bf16.mxu0 %v11989_v1 }
 0x1c5   : > { %11020 = vmatprep.subr.bf16.mxu1 %v11989_v1 }
 0x1c9   : > { %11005 = vmatmul.mubr.msk.bf16.vlgmr.msra.gmra.mrb[24].mxu0 %vm303_vm3, %v11913_v6  ;;  %v7359_v6 = vshll.u32 %v11931_v60, 16  ;;  %v7743_v60 = vshll.u32 %v11943_v54, 16 }
 0x1ca   : > { %11011 = vmatmul.mubr.msk.bf16.vlgmr.msra.gmra.mrb[24].mxu1 %vm303_vm3, %v11914_v7  ;;  %11015 = vmatpush3.bf16.msra.mxu0 %v12776_v56  ;;  %v7175_v7 = vsel %vm290_vm2, %v7170_v61, %v7174_v62  ;;  %v7677_v62 = vshrl.u32 %v11941_v49, 16 }
 0x1cb   : > { %11021 = vmatpush3.bf16.msra.mxu1 %v12776_v56  ;;  %11016 = vmatprep.mubr.msk.bf16.mxu0 %vm11990_vm1, %v11989_v1  ;;  %v11929_v56 = vld [vmem:[%s12046_s22 + $0x60] sm:$0xff]   ;;  %v7361_v14 = vrot.slane %v7359_v6, 1  ;;  %v7745_v6 = vrot.slane %v7743_v60, 1 }
 0x1cc   : > { %11022 = vmatprep.mubr.msk.bf16.mxu1 %vm11990_vm1, %v11989_v1  ;;  %11026 = vmatprep.subr.bf16.mxu0 %v11989_v1  ;;  %v7295_v0 = vshll.u32 %v11929_v56, 16  ;;  %v7293_v8 = vshrl.u32 %v11929_v56, 16  ;;  %v11942_v56 = vld [vmem:[%s12046_s22 + $0xb0] ss:$0 sps:$4 sm:$0x11]  }
 0x1cd   : > { %11032 = vmatprep.subr.bf16.mxu1 %v11989_v1  ;;  %v7362_v2 = vor.u32 %v7361_v14, %v7357_v13 }
 0x1ce   : > { %v7297_v9 = vrot.slane %v7295_v0, 1  ;;  %v7684_v0 = vshll.u32 %v11942_v56, 16  ;;  %v11960_v56 = vld [vmem:[%s12046_s22 + $0x5c] ss:$0 sps:$4 sm:$0x11]  }
 0x1d0   : > { %v7298_v17 = vor.u32 %v7297_v9, %v7293_v8  ;;  %v11947_v8 = vld [vmem:[%s12046_s22 + $0xcc] sm:$0xff]   ;;  %v7686_v10 = vrot.slane %v7684_v0, 1 }
 0x1d1   : > { %11017 = vmatmul.mubr.msk.bf16.vlgmr.msra.gmra.mrb[28].mxu0 %vm303_vm3, %v11915_v15  ;;  %v7364_v15 = vshll.u32 %v11932_v5, 16  ;;  %v7741_v5 = vshrl.u32 %v11943_v54, 16  ;;  %v11958_v54 = vld [vmem:[%s12046_s22 + $0x50] ss:$0 sps:$4 sm:$0x11]  }
 0x1d2   : > { %11023 = vmatmul.mubr.msk.bf16.vlgmr.msra.gmra.mrb[28].mxu1 %vm303_vm3, %v11916_v16  ;;  %11027 = vmatpush3.bf16.msra.mxu0 %v12883_v21  ;;  %v11935_v16 = vld [vmem:[%s12046_s22 + $0x84] sm:$0xff]   ;;  %v7303_v26 = vsel %vm290_vm2, %v7298_v17, %v7302_v18  ;;  %v7805_v18 = vshrl.u32 %v11945_v3, 16  ;;  %v11963_v0 = vld [vmem:[%s12046_s22 + $0x6c] sm:$0xfe]  }
 0x1d3   : > { %11033 = vmatpush3.bf16.msra.mxu1 %v12883_v21  ;;  %11028 = vmatprep.mubr.msk.bf16.mxu0 %vm11990_vm1, %v11989_v1  ;;  %v7366_v22 = vrot.slane %v7364_v15, 1  ;;  %v7487_v24 = vshll.u32 %v11935_v16, 16  ;;  %v7485_v32 = vshrl.u32 %v11935_v16, 16  ;;  %v7746_v13 = vor.u32 %v7745_v6, %v7741_v5  ;;  %v11948_v15 = vld [vmem:[%s12046_s22 + $0xd4] ss:$0 sps:$4 sm:$0x11]  }
 0x1d4   : > { %11034 = vmatprep.mubr.msk.bf16.mxu1 %vm11990_vm1, %v11989_v1  ;;  %11038 = vmatprep.subr.bf16.mxu0 %v11989_v1  ;;  %v7871_v16 = vshll.u32 %v11947_v8, 16  ;;  %v8402_v6 = vrot.slane %v11963_v0, 1 }
 0x1d5   : > { %11044 = vmatprep.subr.bf16.mxu1 %v11989_v1  ;;  %v7367_v31 = vsel %vm290_vm2, %v7362_v2, %v7366_v22  ;;  %v7489_v33 = vrot.slane %v7487_v24, 1  ;;  %v7869_v22 = vshrl.u32 %v11947_v8, 16  ;;  %v7876_v24 = vshll.u32 %v11948_v15, 16 }
 0x1d7   : > { %v7490_v41 = vor.u32 %v7489_v33, %v7485_v32  ;;  %v7878_v29 = vrot.slane %v7876_v24, 1  ;;  %v11949_v32 = vld [vmem:[%s12046_s22 + $0x18] sm:$0xfe]  }
 0x1d8   : > { %v8014_v25 = vrot.slane %v11949_v32, 1 }
 0x1d9   : > { %11029 = vmatmul.mubr.msk.bf16.vlgmr.msra.gmra.mrb[0].mxu0 %vm303_vm3, %v6916_v34  ;;  %v7492_v34 = vshll.u32 %v11936_v23, 16  ;;  %v7873_v23 = vrot.slane %v7871_v16, 1 }
 0x1da   : > { %11035 = vmatmul.mubr.msk.bf16.vlgmr.msra.gmra.mrb[0].mxu1 %vm303_vm3, %v6983_v40  ;;  %11039 = vmatpush3.bf16.msra.mxu0 %v12883_v21  ;;  %v7551_v40 = vshll.u32 %v11937_v30, 16  ;;  %v9853_v30 = vld [vmem:[%s13242_s1 + $0x10] sm:$0x3] }
 0x1db   : > { %11045 = vmatpush3.bf16.msra.mxu1 %v12883_v21  ;;  %11040 = vmatprep.mubr.msk.bf16.mxu0 %vm11990_vm1, %v11989_v1  ;;  %v7494_v42 = vrot.slane %v7492_v34, 1  ;;  %v7874_v28 = vor.u32 %v7873_v23, %v7869_v22  ;;  %v13014_v34 = vsel %vm307_vm0, %v9853_v30, 0  ;;  %v11971_v22 = vld [vmem:[%s12046_s22 + $0x9c] sm:$0xfe]   ;;  %v11973_v30 = vld [vmem:[%s12046_s22 + $0xa8] sm:$0xfe]  }
 0x1dc   : > { %11046 = vmatprep.mubr.msk.bf16.mxu1 %vm11990_vm1, %v11989_v1  ;;  %11050 = vmatprep.subr.bf16.mxu0 %v11989_v1  ;;  %v7553_v47 = vrot.slane %v7551_v40, 1  ;;  %v8072_v40 = vrot.slane %v11951_v35, 1  ;;  %v11972_v23 = vld [vmem:[%s12046_s22 + $0xa4] ss:$0 sps:$4 sm:$0x11]   ;;  %v8677_v35 = vrot.slane %v11973_v30, 1 }
 0x1dd   : > { %11056 = vmatprep.subr.bf16.mxu1 %v11989_v1  ;;  %v7495_v50 = vsel %vm290_vm2, %v7490_v41, %v7494_v42  ;;  %v7879_v33 = vsel %vm290_vm2, %v7874_v28, %v7878_v29  ;;  %v8073_v41 = vrot.slane %v11952_v36, 1  ;;  %v8623_v28 = vrot.slane %v11972_v23, 1 }
 0x1de   : > { %v7554_v38 = vor.u32 %v7553_v47, %v7549_v46  ;;  %v11955_v46 = vld [vmem:[%s12046_s22 + $0x3c] sm:$0xfe]   ;;  %v11956_v47 = vld [vmem:[%s12046_s22 + $0x44] ss:$0 sps:$4 sm:$0x11]  }
 0x1df   : > { %v8183_v51 = vrot.slane %v11956_v47, 1 }
 0x1e0   : > { %v7559_v61 = vsel %vm290_vm2, %v7554_v38, %v7558_v55  ;;  %v11959_v55 = vld [vmem:[%s12046_s22 + $0x54] sm:$0xfe]  }
 0x1e1   : > { %11041 = vmatmul.mubr.msk.bf16.vlgmr.msra.gmra.mrb[4].mxu0 %vm303_vm3, %v7047_v53  ;;  %v7620_v53 = vshll.u32 %v11940_v43, 16  ;;  %v11953_v43 = vld [vmem:[%s12046_s22 + $0x30] sm:$0xfe]  }
 0x1e2   : > { %11047 = vmatmul.mubr.msk.bf16.vlgmr.msra.gmra.mrb[4].mxu1 %vm303_vm3, %v7111_v57  ;;  %11051 = vmatpush3.bf16.msra.mxu0 %v12883_v21  ;;  %v7679_v57 = vshll.u32 %v11941_v49, 16  ;;  %v8127_v48 = vrot.slane %v11953_v43, 1  ;;  %v8128_v49 = vrot.slane %v11954_v44, 1  ;;  %v11979_v44 = vld [vmem:[%s12046_s22 + $0xcc] sm:$0xfe]  }
 0x1e3   : > { %11057 = vmatpush3.bf16.msra.mxu1 %v12883_v21  ;;  %11052 = vmatprep.mubr.msk.bf16.mxu0 %vm11990_vm1, %v11989_v1  ;;  %v7622_v39 = vrot.slane %v7620_v53, 1  ;;  %v11957_v53 = vld [vmem:[%s12046_s22 + $0x48] sm:$0xfe]  }
 0x1e4   : > { %11058 = vmatprep.mubr.msk.bf16.mxu1 %vm11990_vm1, %v11989_v1  ;;  %11062 = vmatprep.subr.bf16.mxu0 %v11989_v1  ;;  %v7681_v63 = vrot.slane %v7679_v57, 1  ;;  %v8129_v52 = vsel %vm2157_vm4, %v8127_v48, %v8128_v49  ;;  %v8237_v57 = vrot.slane %v11957_v53, 1  ;;  %v8842_v48 = vrot.slane %v11979_v44, 1  ;;  %v13150_v53 = vld [vmem:[%s13244_s3] ss:$0 sm:$0xff] }
 0x1e5   : > { %11068 = vmatprep.subr.bf16.mxu1 %v11989_v1  ;;  %v7623_v4 = vsel %vm290_vm2, %v7618_v58, %v7622_v39  ;;  %v8238_v58 = vrot.slane %v11958_v54, 1  ;;  %v8292_v39 = vrot.slane %v11959_v55, 1 }
 0x1e6   : > { %v7682_v9 = vor.u32 %v7681_v63, %v7677_v62  ;;  %v11962_v62 = vld [vmem:[%s12046_s22 + $0x68] ss:$0 sps:$4 sm:$0x11]  }
 0x1e7   : > { %v8239_v60 = vsel %vm2157_vm4, %v8237_v57, %v8238_v58  ;;  %v8348_v5 = vrot.slane %v11962_v62, 1 }
 0x1e8   : > { %v7687_v17 = vsel %vm290_vm2, %v7682_v9, %v7686_v10  ;;  %v11965_v9 = vld [vmem:[%s12046_s22 + $0x78] sm:$0xfe]   ;;  %v11966_v10 = vld [vmem:[%s12046_s22 + $0x80] ss:$0 sps:$4 sm:$0x11]  }
 0x1e9   : > { %11053 = vmatmul.mubr.msk.bf16.vlgmr.msra.gmra.mrb[8].mxu0 %vm303_vm3, %v7175_v7  ;;  %v7748_v7 = vshll.u32 %v11944_v59, 16  ;;  %v8293_v59 = vrot.slane %v11960_v56, 1  ;;  %v8458_v15 = vrot.slane %v11966_v10, 1 }
 0x1ea   : > { %11059 = vmatmul.mubr.msk.bf16.vlgmr.msra.gmra.mrb[8].mxu1 %vm303_vm3, %v7239_v12  ;;  %11063 = vmatpush3.bf16.msra.mxu0 %v12883_v21  ;;  %v7807_v12 = vshll.u32 %v11945_v3, 16  ;;  %v11964_v3 = vld [vmem:[%s12046_s22 + $0x74] ss:$0 sps:$4 sm:$0x11]  }
 0x1eb   : > { %11069 = vmatpush3.bf16.msra.mxu1 %v12883_v21  ;;  %11064 = vmatprep.mubr.msk.bf16.mxu0 %vm11990_vm1, %v11989_v1  ;;  %v7750_v14 = vrot.slane %v7748_v7, 1  ;;  %v8294_v63 = vsel %vm2157_vm4, %v8292_v39, %v8293_v59  ;;  %v8403_v7 = vrot.slane %v11964_v3, 1 }
 0x1ec   : > { %11070 = vmatprep.mubr.msk.bf16.mxu1 %vm11990_vm1, %v11989_v1  ;;  %11074 = vmatprep.subr.bf16.mxu0 %v11989_v1  ;;  %v7809_v19 = vrot.slane %v7807_v12, 1  ;;  %v11967_v12 = vld [vmem:[%s12046_s22 + $0x84] sm:$0xfe]  }
 0x1ed   : > { %11080 = vmatprep.subr.bf16.mxu1 %v11989_v1  ;;  %v7751_v2 = vsel %vm290_vm2, %v7746_v13, %v7750_v14  ;;  %v8404_v11 = vsel %vm2157_vm4, %v8402_v6, %v8403_v7  ;;  %v11968_v13 = vld [vmem:[%s12046_s22 + $0x8c] ss:$0 sps:$4 sm:$0x11]   ;;  %v8457_v14 = vrot.slane %v11965_v9, 1  ;;  %v8512_v16 = vrot.slane %v11967_v12, 1 }
 0x1f1   : > { %11065 = vmatmul.mubr.msk.bf16.vlgmr.msra.gmra.mrb[12].mxu0 %vm303_vm3, %v7303_v26  ;;  %v7810_v26 = vor.u32 %v7809_v19, %v7805_v18  ;;  %v8459_v18 = vsel %vm2157_vm4, %v8457_v14, %v8458_v15  ;;  %v11969_v19 = vld [vmem:[%s12046_s22 + $0x90] sm:$0xfe]  }
 0x1f2   : > { %11071 = vmatmul.mubr.msk.bf16.vlgmr.msra.gmra.mrb[12].mxu1 %vm303_vm3, %v7367_v31  ;;  %11075 = vmatpush3.bf16.msra.mxu0 %v12883_v21  ;;  %v8567_v24 = vrot.slane %v11969_v19, 1 }
 0x1f3   : > { %11081 = vmatpush3.bf16.msra.mxu1 %v12883_v21  ;;  %11076 = vmatprep.mubr.msk.bf16.mxu0 %vm11990_vm1, %v11989_v1  ;;  %v7815_v31 = vsel %vm290_vm2, %v7810_v26, %v7814_v27  ;;  %v8568_v26 = vrot.slane %v11970_v20, 1  ;;  %v8622_v27 = vrot.slane %v11971_v22, 1 }
 0x1f4   : > { %11082 = vmatprep.mubr.msk.bf16.mxu1 %vm11990_vm1, %v11989_v1  ;;  %11086 = vmatprep.subr.bf16.mxu0 %v11989_v1 }
 0x1f5   : > { %11092 = vmatprep.subr.bf16.mxu1 %v11989_v1  ;;  %v8569_v29 = vsel %vm2157_vm4, %v8567_v24, %v8568_v26  ;;  %v8624_v32 = vsel %vm2157_vm4, %v8622_v27, %v8623_v28 }
 0x1f9   : > { %11077 = vmatmul.mubr.msk.bf16.vlgmr.msra.gmra.mrb[16].mxu0 %vm303_vm3, %v7431_v45  ;;  %v8074_v45 = vsel %vm2157_vm4, %v8072_v40, %v8073_v41  ;;  %v11977_v41 = vld [vmem:[%s12046_s22 + $0xc0] sm:$0xfe]  }
 0x1fa   : > { %11083 = vmatmul.mubr.msk.bf16.vlgmr.msra.gmra.mrb[16].mxu1 %vm303_vm3, %v7495_v50  ;;  %11087 = vmatpush3.bf16.msra.mxu0 %v12883_v21  ;;  %v8182_v50 = vrot.slane %v11955_v46, 1  ;;  %v8787_v46 = vrot.slane %v11977_v41, 1 }
 0x1fb   : > { %11093 = vmatpush3.bf16.msra.mxu1 %v12883_v21  ;;  %11088 = vmatprep.mubr.msk.bf16.mxu0 %vm11990_vm1, %v11989_v1 }
 0x1fc   : > { %11094 = vmatprep.mubr.msk.bf16.mxu1 %vm11990_vm1, %v11989_v1  ;;  %11098 = vmatprep.subr.bf16.mxu0 %v11989_v1  ;;  %v8184_v38 = vsel %vm2157_vm4, %v8182_v50, %v8183_v51 }
 0x1fd   : > { %11104 = vmatprep.subr.bf16.mxu1 %v11989_v1 }
 0x201   : > { %11089 = vmatmul.mubr.msk.bf16.vlgmr.msra.gmra.mrb[20].mxu0 %vm303_vm3, %v7559_v61  ;;  %v11961_v61 = vld [vmem:[%s12046_s22 + $0x60] sm:$0xfe]  }
 0x202   : > { %11095 = vmatmul.mubr.msk.bf16.vlgmr.msra.gmra.mrb[20].mxu1 %vm303_vm3, %v7623_v4  ;;  %11099 = vmatpush3.bf16.msra.mxu0 %v12883_v21  ;;  %v8347_v4 = vrot.slane %v11961_v61, 1 }
 0x203   : > { %11105 = vmatpush3.bf16.msra.mxu1 %v12883_v21  ;;  %11100 = vmatprep.mubr.msk.bf16.mxu0 %vm11990_vm1, %v11989_v1 }
 0x204   : > { %11106 = vmatprep.mubr.msk.bf16.mxu1 %vm11990_vm1, %v11989_v1  ;;  %11110 = vmatprep.subr.bf16.mxu0 %v11989_v1  ;;  %v8349_v8 = vsel %vm2157_vm4, %v8347_v4, %v8348_v5 }
 0x205   : > { %11116 = vmatprep.subr.bf16.mxu1 %v11989_v1 }
 0x209   : > { %11101 = vmatmul.mubr.msk.bf16.vlgmr.msra.gmra.mrb[24].mxu0 %vm303_vm3, %v7687_v17  ;;  %v8513_v17 = vrot.slane %v11968_v13, 1 }
 0x20a   : > { %11107 = vmatmul.mubr.msk.bf16.vlgmr.msra.gmra.mrb[24].mxu1 %vm303_vm3, %v7751_v2  ;;  %11111 = vmatpush3.bf16.msra.mxu0 %v12883_v21 }
 0x20b   : > { %11117 = vmatpush3.bf16.msra.mxu1 %v12883_v21  ;;  %11112 = vmatprep.mubr.msk.bf16.mxu0 %vm11990_vm1, %v11989_v1  ;;  %v11950_v21 = vld [vmem:[%s12046_s22 + $0x20] ss:$0 sps:$4 sm:$0x11]   ;;  %v8514_v2 = vsel %vm2157_vm4, %v8512_v16, %v8513_v17 }
 0x20c   : > { %11118 = vmatprep.mubr.msk.bf16.mxu1 %vm11990_vm1, %v11989_v1  ;;  %11122 = vmatprep.subr.bf16.mxu0 %v11989_v1  ;;  %v8015_v37 = vrot.slane %v11950_v21, 1  ;;  %v11975_v21 = vld [vmem:[%s12046_s22 + $0xb4] sm:$0xfe]  }
 0x20d   : > { %11128 = vmatprep.subr.bf16.mxu1 %v11989_v1 }
 0x20e   : > { %v8016_v42 = vsel %vm2157_vm4, %v8014_v25, %v8015_v37  ;;  %v8732_v25 = vrot.slane %v11975_v21, 1 }
 0x211   : > { %11113 = vmatmul.mubr.msk.bf16.vlgmr.msra.gmra.mrb[28].mxu0 %vm303_vm3, %v7815_v31  ;;  %v11974_v31 = vld [vmem:[%s12046_s22 + $0xb0] ss:$0 sps:$4 sm:$0x11]  }
 0x212   : > { %11119 = vmatmul.mubr.msk.bf16.vlgmr.msra.gmra.mrb[28].mxu1 %vm303_vm3, %v7879_v33  ;;  %11123 = vmatpush3.bf16.msra.mxu0 %v13014_v34  ;;  %v11976_v33 = vld [vmem:[%s12046_s22 + $0xbc] ss:$0 sps:$4 sm:$0x11]   ;;  %v8678_v36 = vrot.slane %v11974_v31, 1 }
 0x213   : > { %11129 = vmatpush3.bf16.msra.mxu1 %v13014_v34  ;;  %11124 = vmatprep.mubr.msk.bf16.mxu0 %vm11990_vm1, %v11989_v1  ;;  %v8733_v37 = vrot.slane %v11976_v33, 1 }
 0x214   : > { %11130 = vmatprep.mubr.msk.bf16.mxu1 %vm11990_vm1, %v11989_v1  ;;  %11134 = vmatprep.subr.bf16.mxu0 %v11989_v1  ;;  %v8679_v40 = vsel %vm2157_vm4, %v8677_v35, %v8678_v36 }
 0x215   : > { %11140 = vmatprep.subr.bf16.mxu1 %v11989_v1  ;;  %v8734_v43 = vsel %vm2157_vm4, %v8732_v25, %v8733_v37 }
 0x219   : > { %11125 = vmatmul.mubr.msk.bf16.vlgmr.msra.gmra.mrb[0].mxu0 %vm303_vm3, %v8016_v42  ;;  %v11978_v42 = vld [vmem:[%s12046_s22 + $0xc8] ss:$0 sps:$4 sm:$0x11]  }
 0x21a   : > { %11131 = vmatmul.mubr.msk.bf16.vlgmr.msra.gmra.mrb[0].mxu1 %vm303_vm3, %v8074_v45  ;;  %11135 = vmatpush3.bf16.msra.mxu0 %v13014_v34  ;;  %v11980_v45 = vld [vmem:[%s12046_s22 + $0xd4] ss:$0 sps:$4 sm:$0x11]   ;;  %v8788_v47 = vrot.slane %v11978_v42, 1  ;;  %s13164_s22 = scalar_lea.vmem %s13245_s4, %s9938_s19 }
 0x21b   : > { %11141 = vmatpush3.bf16.msra.mxu1 %v13014_v34  ;;  %11136 = vmatprep.mubr.msk.bf16.mxu0 %vm11990_vm1, %v11989_v1  ;;  %v8843_v49 = vrot.slane %v11980_v45, 1 }
 0x21c   : > { %11142 = vmatprep.mubr.msk.bf16.mxu1 %vm11990_vm1, %v11989_v1  ;;  %11146 = vmatprep.subr.bf16.mxu0 %v11989_v1  ;;  %v8789_v50 = vsel %vm2157_vm4, %v8787_v46, %v8788_v47 }
 0x21d   : > { %11152 = vmatprep.subr.bf16.mxu1 %v11989_v1  ;;  %v8844_v51 = vsel %vm2157_vm4, %v8842_v48, %v8843_v49 }
 0x221   : > { %11137 = vmatmul.mubr.msk.bf16.vlgmr.msra.gmra.mrb[4].mxu0 %vm303_vm3, %v8129_v52 }
 0x222   : > { %11143 = vmatmul.mubr.msk.bf16.vlgmr.msra.gmra.mrb[4].mxu1 %vm303_vm3, %v8184_v38  ;;  %11147 = vmatpush3.bf16.msra.mxu0 %v13014_v34 }
 0x223   : > { %11153 = vmatpush3.bf16.msra.mxu1 %v13014_v34  ;;  %11148 = vmatprep.mubr.msk.bf16.mxu0 %vm11990_vm1, %v11989_v1 }
 0x224   : > { %11154 = vmatprep.mubr.msk.bf16.mxu1 %vm11990_vm1, %v11989_v1  ;;  %11158 = vmatprep.subr.bf16.mxu0 %v11989_v1 }
 0x225   : > { %11164 = vmatprep.subr.bf16.mxu1 %v11989_v1 }
 0x229   : > { %11149 = vmatmul.mubr.msk.bf16.vlgmr.msra.gmra.mrb[8].mxu0 %vm303_vm3, %v8239_v60 }
 0x22a   : > { %11155 = vmatmul.mubr.msk.bf16.vlgmr.msra.gmra.mrb[8].mxu1 %vm303_vm3, %v8294_v63  ;;  %11159 = vmatpush3.bf16.msra.mxu0 %v13014_v34 }
 0x22b   : > { %11165 = vmatpush3.bf16.msra.mxu1 %v13014_v34  ;;  %11160 = vmatprep.mubr.msk.bf16.mxu0 %vm11990_vm1, %v11989_v1 }
 0x22c   : > { %11166 = vmatprep.mubr.msk.bf16.mxu1 %vm11990_vm1, %v11989_v1  ;;  %11170 = vmatprep.subr.bf16.mxu0 %v11989_v1 }
 0x22d   : > { %11176 = vmatprep.subr.bf16.mxu1 %v11989_v1 }
 0x231   : > { %11161 = vmatmul.mubr.msk.bf16.vlgmr.msra.gmra.mrb[12].mxu0 %vm303_vm3, %v8349_v8 }
 0x232   : > { %11167 = vmatmul.mubr.msk.bf16.vlgmr.msra.gmra.mrb[12].mxu1 %vm303_vm3, %v8404_v11  ;;  %11171 = vmatpush3.bf16.msra.mxu0 %v13014_v34 }
 0x233   : > { %11177 = vmatpush3.bf16.msra.mxu1 %v13014_v34  ;;  %11172 = vmatprep.mubr.msk.bf16.mxu0 %vm11990_vm1, %v11989_v1 }
 0x234   : > { %11178 = vmatprep.mubr.msk.bf16.mxu1 %vm11990_vm1, %v11989_v1  ;;  %11182 = vmatprep.subr.bf16.mxu0 %v11989_v1 }
 0x235   : > { %11188 = vmatprep.subr.bf16.mxu1 %v11989_v1 }
 0x239   : > { %11173 = vmatmul.mubr.msk.bf16.vlgmr.msra.gmra.mrb[16].mxu0 %vm303_vm3, %v8459_v18 }
 0x23a   : > { %11179 = vmatmul.mubr.msk.bf16.vlgmr.msra.gmra.mrb[16].mxu1 %vm303_vm3, %v8514_v2  ;;  %11183 = vmatpush3.bf16.msra.mxu0 %v13014_v34 }
 0x23b   : > { %11189 = vmatpush3.bf16.msra.mxu1 %v13014_v34  ;;  %11184 = vmatprep.mubr.msk.bf16.mxu0 %vm11990_vm1, %v11989_v1 }
 0x23c   : > { %11190 = vmatprep.mubr.msk.bf16.mxu1 %vm11990_vm1, %v11989_v1  ;;  %11194 = vmatprep.subr.bf16.mxu0 %v11989_v1 }
 0x23d   : > { %11200 = vmatprep.subr.bf16.mxu1 %v11989_v1 }
 0x241   : > { %11185 = vmatmul.mubr.msk.bf16.vlgmr.msra.gmra.mrb[20].mxu0 %vm303_vm3, %v8569_v29 }
 0x242   : > { %11191 = vmatmul.mubr.msk.bf16.vlgmr.msra.gmra.mrb[20].mxu1 %vm303_vm3, %v8624_v32  ;;  %11195 = vmatpush3.bf16.msra.mxu0 %v13014_v34 }
 0x243   : > { %11201 = vmatpush3.bf16.msra.mxu1 %v13014_v34  ;;  %11196 = vmatprep.mubr.msk.bf16.mxu0 %vm11990_vm1, %v11989_v1 }
 0x244   : > { %11202 = vmatprep.mubr.msk.bf16.mxu1 %vm11990_vm1, %v11989_v1  ;;  %11206 = vmatprep.subr.bf16.mxu0 %v11989_v1 }
 0x245   : > { %11212 = vmatprep.subr.bf16.mxu1 %v11989_v1 }
 0x249   : > { %11197 = vmatmul.mubr.msk.bf16.vlgmr.msra.gmra.mrb[24].mxu0 %vm303_vm3, %v8679_v40 }
 0x24a   : > { %11203 = vmatmul.mubr.msk.bf16.vlgmr.msra.gmra.mrb[24].mxu1 %vm303_vm3, %v8734_v43  ;;  %11207 = vmatpush3.bf16.msra.mxu0 %v13014_v34 }
 0x24b   : > { %11213 = vmatpush3.bf16.msra.mxu1 %v13014_v34  ;;  %11208 = vmatprep.mubr.msk.bf16.mxu0 %vm11990_vm1, %v11989_v1  ;;  %v13145_v34 = vld [vmem:[%s13243_s2] ss:$0 sm:$0xff] }
 0x24c   : > { %11214 = vmatprep.mubr.msk.bf16.mxu1 %vm11990_vm1, %v11989_v1 }
 0x251   : > { %11209 = vmatmul.mubr.msk.bf16.vlgmr.msra.gmra.mrb[28].mxu0 %vm303_vm3, %v8789_v50 }
 0x252   : > { %11215 = vmatmul.mubr.msk.bf16.vlgmr.msra.gmra.mrb[28].mxu1 %vm303_vm3, %v8844_v51 }
 0x2ec   : > { %v8057_v52 = vpop.f32.mrb[0].mxu0 }
 0x2ed   : > { %v8928_v1 = vmul.f32 %v13145_v34, %v8057_v52  ;;  %v8112_v54 = vpop.f32.mrb[0].mxu1  ;;  %v11126_v38 = vpop.f32.mrb[1].mxu0 }
 0x2ee   : > { %v8930_v55 = vmul.f32 %v13145_v34, %v8112_v54  ;;  %v11132_v56 = vpop.f32.mrb[1].mxu1  ;;  %v8060_v57 = vpop.f32.mrb[2].mxu0 }
 0x2ef   : > { %v8967_v58 = vadd.f32 %v13150_v53, %v8928_v1  ;;  %v8929_v39 = vmul.f32 %v13145_v34, %v8060_v57  ;;  %v8115_v59 = vpop.f32.mrb[2].mxu1  ;;  %v11127_v60 = vpop.f32.mrb[3].mxu0 }
 0x2f0   : > { %v8969_v61 = vadd.f32 %v13150_v53, %v8930_v55  ;;  %v8931_v62 = vmul.f32 %v13145_v34, %v8115_v59  ;;  %v11133_v63 = vpop.f32.mrb[3].mxu1 }
 0x2f1   : > { %v8968_v0 = vadd.f32 %v13150_v53, %v8929_v39  ;;  %v8999_v4 = vmax.f32 %v8967_v58, 0.0 }
 0x2f2   : > { %v8970_v3 = vadd.f32 %v13150_v53, %v8931_v62  ;;  %v9001_v6 = vmax.f32 %v8969_v61, 0.0 }
 0x2f3   : > { %v9000_v5 = vmax.f32 %v8968_v0, 0.0 }
 0x2f4   : > { %v9002_v7 = vmax.f32 %v8970_v3, 0.0  ;;  %v8167_v8 = vpop.f32.mrb[4].mxu0 }
 0x2f5   : > { %v9974_v9 = vpack.c.bf16 %v9000_v5, %v8999_v4  ;;  %v8932_v10 = vmul.f32 %v13145_v34, %v8167_v8  ;;  %v8222_v11 = vpop.f32.mrb[4].mxu1  ;;  %v11138_v12 = vpop.f32.mrb[5].mxu0 }
 0x2f6   : > { %v9979_v13 = vpack.c.bf16 %v9002_v7, %v9001_v6  ;;  %v8934_v14 = vmul.f32 %v13145_v34, %v8222_v11  ;;  %v11144_v15 = vpop.f32.mrb[5].mxu1  ;;  %v8170_v16 = vpop.f32.mrb[6].mxu0 }
 0x2f7   : > { %9975 = vst [vmem:[%s13164_s22] sm:$0xff] %v9974_v9   ;;  %v8971_v17 = vadd.f32 %v13150_v53, %v8932_v10  ;;  %v8933_v18 = vmul.f32 %v13145_v34, %v8170_v16  ;;  %v8225_v19 = vpop.f32.mrb[6].mxu1  ;;  %v11139_v20 = vpop.f32.mrb[7].mxu0 }
 0x2f8   : > { %10051 = vst [vmem:[%s13164_s22 + $0x8] sm:$0xff] %v9979_v13   ;;  %v8973_v2 = vadd.f32 %v13150_v53, %v8934_v14  ;;  %v8935_v22 = vmul.f32 %v13145_v34, %v8225_v19  ;;  %v11145_v23 = vpop.f32.mrb[7].mxu1 }
 0x2f9   : > { %v8972_v24 = vadd.f32 %v13150_v53, %v8933_v18  ;;  %v9003_v27 = vmax.f32 %v8971_v17, 0.0 }
 0x2fa   : > { %v8974_v26 = vadd.f32 %v13150_v53, %v8935_v22  ;;  %v9005_v29 = vmax.f32 %v8973_v2, 0.0 }
 0x2fb   : > { %v9004_v28 = vmax.f32 %v8972_v24, 0.0 }
 0x2fc   : > { %v9006_v30 = vmax.f32 %v8974_v26, 0.0  ;;  %v8277_v31 = vpop.f32.mrb[8].mxu0 }
 0x2fd   : > { %v9984_v32 = vpack.c.bf16 %v9004_v28, %v9003_v27  ;;  %v8936_v21 = vmul.f32 %v13145_v34, %v8277_v31  ;;  %v8332_v33 = vpop.f32.mrb[8].mxu1  ;;  %v11150_v35 = vpop.f32.mrb[9].mxu0 }
 0x2fe   : > { %v9989_v36 = vpack.c.bf16 %v9006_v30, %v9005_v29  ;;  %v8938_v25 = vmul.f32 %v13145_v34, %v8332_v33  ;;  %v11156_v37 = vpop.f32.mrb[9].mxu1  ;;  %v8280_v40 = vpop.f32.mrb[10].mxu0 }
 0x2ff   : > { %10052 = vst [vmem:[%s13164_s22 + $0x10] sm:$0xff] %v9984_v32   ;;  %v8975_v41 = vadd.f32 %v13150_v53, %v8936_v21  ;;  %v8937_v42 = vmul.f32 %v13145_v34, %v8280_v40  ;;  %v8335_v43 = vpop.f32.mrb[10].mxu1  ;;  %v11151_v44 = vpop.f32.mrb[11].mxu0 }
 0x300   : > { %10053 = vst [vmem:[%s13164_s22 + $0x18] sm:$0xff] %v9989_v36   ;;  %v8977_v45 = vadd.f32 %v13150_v53, %v8938_v25  ;;  %v8939_v46 = vmul.f32 %v13145_v34, %v8335_v43  ;;  %v11157_v47 = vpop.f32.mrb[11].mxu1 }
 0x301   : > { %v8976_v48 = vadd.f32 %v13150_v53, %v8937_v42  ;;  %v9007_v50 = vmax.f32 %v8975_v41, 0.0 }
 0x302   : > { %v8978_v49 = vadd.f32 %v13150_v53, %v8939_v46  ;;  %v9009_v52 = vmax.f32 %v8977_v45, 0.0 }
 0x303   : > { %v9008_v51 = vmax.f32 %v8976_v48, 0.0 }
 0x304   : > { %v9010_v1 = vmax.f32 %v8978_v49, 0.0  ;;  %v8387_v54 = vpop.f32.mrb[12].mxu0 }
 0x305   : > { %v9994_v38 = vpack.c.bf16 %v9008_v51, %v9007_v50  ;;  %v8940_v55 = vmul.f32 %v13145_v34, %v8387_v54  ;;  %v8442_v56 = vpop.f32.mrb[12].mxu1  ;;  %v11162_v57 = vpop.f32.mrb[13].mxu0 }
 0x306   : > { %v9999_v58 = vpack.c.bf16 %v9010_v1, %v9009_v52  ;;  %v8942_v39 = vmul.f32 %v13145_v34, %v8442_v56  ;;  %v11168_v59 = vpop.f32.mrb[13].mxu1  ;;  %v8390_v60 = vpop.f32.mrb[14].mxu0 }
 0x307   : > { %10054 = vst [vmem:[%s13164_s22 + $0x20] sm:$0xff] %v9994_v38   ;;  %v8979_v61 = vadd.f32 %v13150_v53, %v8940_v55  ;;  %v8941_v62 = vmul.f32 %v13145_v34, %v8390_v60  ;;  %v8445_v63 = vpop.f32.mrb[14].mxu1  ;;  %v11163_v0 = vpop.f32.mrb[15].mxu0 }
 0x308   : > { %10055 = vst [vmem:[%s13164_s22 + $0x28] sm:$0xff] %v9999_v58   ;;  %v8981_v3 = vadd.f32 %v13150_v53, %v8942_v39  ;;  %v8943_v4 = vmul.f32 %v13145_v34, %v8445_v63  ;;  %v11169_v5 = vpop.f32.mrb[15].mxu1 }
 0x309   : > { %v8980_v6 = vadd.f32 %v13150_v53, %v8941_v62  ;;  %v9011_v8 = vmax.f32 %v8979_v61, 0.0 }
 0x30a   : > { %v8982_v7 = vadd.f32 %v13150_v53, %v8943_v4  ;;  %v9013_v10 = vmax.f32 %v8981_v3, 0.0 }
 0x30b   : > { %v9012_v9 = vmax.f32 %v8980_v6, 0.0 }
 0x30c   : > { %v9014_v11 = vmax.f32 %v8982_v7, 0.0  ;;  %v8497_v12 = vpop.f32.mrb[16].mxu0 }
 0x30d   : > { %v10004_v13 = vpack.c.bf16 %v9012_v9, %v9011_v8  ;;  %v8944_v14 = vmul.f32 %v13145_v34, %v8497_v12  ;;  %v8552_v15 = vpop.f32.mrb[16].mxu1  ;;  %v11174_v16 = vpop.f32.mrb[17].mxu0 }
 0x30e   : > { %v10009_v17 = vpack.c.bf16 %v9014_v11, %v9013_v10  ;;  %v8946_v18 = vmul.f32 %v13145_v34, %v8552_v15  ;;  %v11180_v19 = vpop.f32.mrb[17].mxu1  ;;  %v8500_v20 = vpop.f32.mrb[18].mxu0 }
 0x30f   : > { %10056 = vst [vmem:[%s13164_s22 + $0x30] sm:$0xff] %v10004_v13   ;;  %v8983_v2 = vadd.f32 %v13150_v53, %v8944_v14  ;;  %v8945_v22 = vmul.f32 %v13145_v34, %v8500_v20  ;;  %v8555_v23 = vpop.f32.mrb[18].mxu1  ;;  %v11175_v24 = vpop.f32.mrb[19].mxu0 }
 0x310   : > { %10057 = vst [vmem:[%s13164_s22 + $0x38] sm:$0xff] %v10009_v17   ;;  %v8985_v26 = vadd.f32 %v13150_v53, %v8946_v18  ;;  %v8947_v27 = vmul.f32 %v13145_v34, %v8555_v23  ;;  %v11181_v28 = vpop.f32.mrb[19].mxu1 }
 0x311   : > { %v8984_v29 = vadd.f32 %v13150_v53, %v8945_v22  ;;  %v9015_v31 = vmax.f32 %v8983_v2, 0.0 }
 0x312   : > { %v8986_v30 = vadd.f32 %v13150_v53, %v8947_v27  ;;  %v9017_v21 = vmax.f32 %v8985_v26, 0.0 }
 0x313   : > { %v9016_v32 = vmax.f32 %v8984_v29, 0.0 }
 0x314   : > { %v9018_v33 = vmax.f32 %v8986_v30, 0.0  ;;  %v8607_v35 = vpop.f32.mrb[20].mxu0 }
 0x315   : > { %v10014_v36 = vpack.c.bf16 %v9016_v32, %v9015_v31  ;;  %v8948_v25 = vmul.f32 %v13145_v34, %v8607_v35  ;;  %v8662_v37 = vpop.f32.mrb[20].mxu1  ;;  %v11186_v40 = vpop.f32.mrb[21].mxu0 }
 0x316   : > { %v10019_v41 = vpack.c.bf16 %v9018_v33, %v9017_v21  ;;  %v8950_v42 = vmul.f32 %v13145_v34, %v8662_v37  ;;  %v11192_v43 = vpop.f32.mrb[21].mxu1  ;;  %v8610_v44 = vpop.f32.mrb[22].mxu0 }
 0x317   : > { %10058 = vst [vmem:[%s13164_s22 + $0x40] sm:$0xff] %v10014_v36   ;;  %v8987_v45 = vadd.f32 %v13150_v53, %v8948_v25  ;;  %v8949_v46 = vmul.f32 %v13145_v34, %v8610_v44  ;;  %v8665_v47 = vpop.f32.mrb[22].mxu1  ;;  %v11187_v48 = vpop.f32.mrb[23].mxu0 }
 0x318   : > { %10059 = vst [vmem:[%s13164_s22 + $0x48] sm:$0xff] %v10019_v41   ;;  %v8989_v49 = vadd.f32 %v13150_v53, %v8950_v42  ;;  %v8951_v50 = vmul.f32 %v13145_v34, %v8665_v47  ;;  %v11193_v51 = vpop.f32.mrb[23].mxu1 }
 0x319   : > { %v8988_v52 = vadd.f32 %v13150_v53, %v8949_v46  ;;  %v9019_v54 = vmax.f32 %v8987_v45, 0.0 }
 0x31a   : > { %v8990_v1 = vadd.f32 %v13150_v53, %v8951_v50  ;;  %v9021_v55 = vmax.f32 %v8989_v49, 0.0 }
 0x31b   : > { %v9020_v38 = vmax.f32 %v8988_v52, 0.0 }
 0x31c   : > { %v9022_v56 = vmax.f32 %v8990_v1, 0.0  ;;  %v8717_v57 = vpop.f32.mrb[24].mxu0 }
 0x31d   : > { %v10024_v58 = vpack.c.bf16 %v9020_v38, %v9019_v54  ;;  %v8952_v39 = vmul.f32 %v13145_v34, %v8717_v57  ;;  %v8772_v59 = vpop.f32.mrb[24].mxu1  ;;  %v11198_v60 = vpop.f32.mrb[25].mxu0 }
 0x31e   : > { %v10029_v61 = vpack.c.bf16 %v9022_v56, %v9021_v55  ;;  %v8954_v62 = vmul.f32 %v13145_v34, %v8772_v59  ;;  %v11204_v63 = vpop.f32.mrb[25].mxu1  ;;  %v8720_v0 = vpop.f32.mrb[26].mxu0 }
 0x31f   : > { %10060 = vst [vmem:[%s13164_s22 + $0x50] sm:$0xff] %v10024_v58   ;;  %v8991_v3 = vadd.f32 %v13150_v53, %v8952_v39  ;;  %v8953_v4 = vmul.f32 %v13145_v34, %v8720_v0  ;;  %v8775_v5 = vpop.f32.mrb[26].mxu1  ;;  %v11199_v6 = vpop.f32.mrb[27].mxu0 }
 0x320   : > { %10061 = vst [vmem:[%s13164_s22 + $0x58] sm:$0xff] %v10029_v61   ;;  %v8993_v7 = vadd.f32 %v13150_v53, %v8954_v62  ;;  %v8955_v8 = vmul.f32 %v13145_v34, %v8775_v5  ;;  %v11205_v9 = vpop.f32.mrb[27].mxu1 }
 0x321   : > { %v8992_v10 = vadd.f32 %v13150_v53, %v8953_v4  ;;  %v9023_v12 = vmax.f32 %v8991_v3, 0.0 }
 0x322   : > { %v8994_v11 = vadd.f32 %v13150_v53, %v8955_v8  ;;  %v9025_v14 = vmax.f32 %v8993_v7, 0.0 }
 0x323   : > { %v9024_v13 = vmax.f32 %v8992_v10, 0.0 }
 0x324   : > { %v9026_v15 = vmax.f32 %v8994_v11, 0.0  ;;  %v8827_v16 = vpop.f32.mrb[28].mxu0 }
 0x325   : > { %v10034_v17 = vpack.c.bf16 %v9024_v13, %v9023_v12  ;;  %v8956_v18 = vmul.f32 %v13145_v34, %v8827_v16  ;;  %v8882_v19 = vpop.f32.mrb[28].mxu1  ;;  %v11210_v20 = vpop.f32.mrb[29].mxu0 }
 0x326   : > { %v10039_v2 = vpack.c.bf16 %v9026_v15, %v9025_v14  ;;  %v8958_v22 = vmul.f32 %v13145_v34, %v8882_v19  ;;  %v11216_v23 = vpop.f32.mrb[29].mxu1  ;;  %v8830_v24 = vpop.f32.mrb[30].mxu0 }
 0x327   : > { %10062 = vst [vmem:[%s13164_s22 + $0x60] sm:$0xff] %v10034_v17   ;;  %v8995_v26 = vadd.f32 %v13150_v53, %v8956_v18  ;;  %v8957_v27 = vmul.f32 %v13145_v34, %v8830_v24  ;;  %v8885_v28 = vpop.f32.mrb[30].mxu1  ;;  %v11211_v29 = vpop.f32.mrb[31].mxu0 }
 0x328   : > { %10063 = vst [vmem:[%s13164_s22 + $0x68] sm:$0xff] %v10039_v2   ;;  %v8997_v30 = vadd.f32 %v13150_v53, %v8958_v22  ;;  %v8959_v31 = vmul.f32 %v13145_v34, %v8885_v28  ;;  %v11217_v32 = vpop.f32.mrb[31].mxu1 }
 0x329   : > { %v8996_v21 = vadd.f32 %v13150_v53, %v8957_v27  ;;  %v9027_v35 = vmax.f32 %v8995_v26, 0.0 }
 0x32a   : > { %v8998_v33 = vadd.f32 %v13150_v53, %v8959_v31  ;;  %v9029_v25 = vmax.f32 %v8997_v30, 0.0 }
 0x32b   : > { %v9028_v36 = vmax.f32 %v8996_v21, 0.0 }
 0x32c   : > { %v9030_v37 = vmax.f32 %v8998_v33, 0.0 }
 0x32d   : > { %v10044_v40 = vpack.c.bf16 %v9028_v36, %v9027_v35 }
 0x32e   : > { %v10049_v41 = vpack.c.bf16 %v9030_v37, %v9029_v25 }
 0x32f   : > { %10064 = vst [vmem:[%s13164_s22 + $0x70] sm:$0xff] %v10044_v40  }
 0x330   : > { %10065 = vst [vmem:[%s13164_s22 + $0x78] sm:$0xff] %v10049_v41  }
 0x331 PF: > { %s14_s15 = sadd.s32 1, %s11987_s15  }
 0x332   : > { %p11_p4 = scmp.ge.s32.totalorder %s14_s15, 4  }
 0x334   :  { %13 = sbr.rel (!%p11_p4) target bundleno = 1 (0x1), region = 76 }

</bundles_post_ra>
